<compile_context>
chip_gen: v7x
topology: tpu7x:2x2x1
jax: 0.10.0
libtpu: 0.0.40
codegen_flags: <defaults>
</compile_context>

<pallas_src>
import functools

import jax
import jax.numpy as jnp
from jax.experimental import pallas as pl
from jax.experimental.pallas import tpu as pltpu

N_RELATION_CLASSES = 12
N_RELATIVE_POSITIONS = 8
N_PRED_CH = N_RELATION_CLASSES * N_RELATIVE_POSITIONS   # 96
N_PRED_CH_PAD = 128                                     # lane-dense pred output
TEMPERATURE = 0.03
VMEM_LIMIT_BYTES = 32 * 1024 * 1024


def _round_up(x, m):
    return ((x + m - 1) // m) * m


def _pad_rows(x, m_pad):
    m = x.shape[0]
    if m == m_pad:
        return x
    return jnp.pad(x, ((0, m_pad - m), (0, 0)))


# ---------------------------------------------------------------------------
# Pallas kernels
# ---------------------------------------------------------------------------
def _matmul_bias_kernel(x_ref, w_ref, b_ref, o_ref):
    """(TM, K) @ (K, N) + bias -> (TM, N). bf16 operands, f32 accumulate."""
    acc = jnp.dot(x_ref[...], w_ref[...], preferred_element_type=jnp.float32)
    o_ref[...] = (acc + b_ref[...]).astype(o_ref.dtype)


def _resize_kernel(x_ref, xc_ref, w_main_ref, w_ctx_ref, b_ref, o_ref):
    """Fused resize conv without concatenation: x@(W1+W3) + x_context@W2 + b."""
    acc = jnp.dot(x_ref[...], w_main_ref[...], preferred_element_type=jnp.float32)
    acc = acc + jnp.dot(xc_ref[...], w_ctx_ref[...],
                        preferred_element_type=jnp.float32)
    o_ref[...] = (acc + b_ref[...]).astype(o_ref.dtype)


def conv1x1(x2d, w, b, *, tm=1024):
    """1x1x1 conv as a tiled matmul. x2d: (M, K), w: (K, N), b: (N,) -> (M, N) f32."""
    M, K = x2d.shape
    Kw, N = w.shape
    assert K == Kw
    tm_eff = min(_round_up(tm, 128), _round_up(M, 128))
    m_pad = _round_up(M, tm_eff)
    xp = _pad_rows(x2d, m_pad)
    out = pl.pallas_call(
        _matmul_bias_kernel,
        out_shape=jax.ShapeDtypeStruct((m_pad, N), jnp.float32),
        grid=(m_pad // tm_eff,),
        in_specs=[
            pl.BlockSpec((tm_eff, K), lambda i: (i, 0)),
            pl.BlockSpec((K, N), lambda i: (0, 0)),
            pl.BlockSpec((1, N), lambda i: (0, 0)),
        ],
        out_specs=pl.BlockSpec((tm_eff, N), lambda i: (i, 0)),
        compiler_params=pltpu.CompilerParams(
            dimension_semantics=("parallel",),
            vmem_limit_bytes=VMEM_LIMIT_BYTES),
    )(xp, w, b.reshape(1, N).astype(jnp.float32))
    return out[:M] if m_pad != M else out


def resize_conv(x2d, xc2d, w_main, w_ctx, b, *, tm=1024):
    """Fused resize conv. x2d: (M, C), xc2d: (M, 96) -> (M, N) f32."""
    M, K1 = x2d.shape
    M2, K2 = xc2d.shape
    assert M == M2
    N = w_main.shape[1]
    tm_eff = min(_round_up(tm, 128), _round_up(M, 128))
    m_pad = _round_up(M, tm_eff)
    xp = _pad_rows(x2d, m_pad)
    xcp = _pad_rows(xc2d, m_pad)
    out = pl.pallas_call(
        _resize_kernel,
        out_shape=jax.ShapeDtypeStruct((m_pad, N), jnp.float32),
        grid=(m_pad // tm_eff,),
        in_specs=[
            pl.BlockSpec((tm_eff, K1), lambda i: (i, 0)),
            pl.BlockSpec((tm_eff, K2), lambda i: (i, 0)),
            pl.BlockSpec((K1, N), lambda i: (0, 0)),
            pl.BlockSpec((K2, N), lambda i: (0, 0)),
            pl.BlockSpec((1, N), lambda i: (0, 0)),
        ],
        out_specs=pl.BlockSpec((tm_eff, N), lambda i: (i, 0)),
        compiler_params=pltpu.CompilerParams(
            dimension_semantics=("parallel",),
            vmem_limit_bytes=VMEM_LIMIT_BYTES),
    )(xp, xcp, w_main, w_ctx, b.reshape(1, N).astype(jnp.float32))
    return out[:M] if m_pad != M else out


# ---------------------------------------------------------------------------
# Index-map handling (torch module passes per-batch (K, 4) arrays or None)
# ---------------------------------------------------------------------------
def _stack_index_maps(maps, s_flat):
    """Stack per-batch (K_i, 4) index arrays (or None) into (bs, K_max, 4).

    Padding / None rows are filled with the out-of-bounds sentinel `s_flat`,
    so the downstream scatter (mode='drop') ignores them."""
    ks = [int(m.shape[0]) for m in maps if m is not None]
    k_max = max(ks) if ks else 1
    rows = []
    for m in maps:
        if m is None:
            rows.append(jnp.full((k_max, 4), s_flat, dtype=jnp.int32))
        else:
            m = jnp.asarray(m, jnp.int32)
            pad = k_max - m.shape[0]
            if pad:
                m = jnp.concatenate(
                    [m, jnp.full((pad, 4), s_flat, dtype=jnp.int32)], axis=0)
            rows.append(m)
    return jnp.stack(rows, axis=0)


# ---------------------------------------------------------------------------
# Forward pass (wrapper = glue; hot matmuls run in the Pallas kernels above)
# ---------------------------------------------------------------------------
def rp_context_prior_forward(x_in, masks, map_contexts, map_Ps, params, *, tm=1024):
    """Mirrors RPContextPrior.forward.

    x_in: (bs, c, h, w, d); map_contexts / map_Ps: per-batch (K, 4) arrays
    with columns (h, w, d, relative_position), entries may be None.
    Returns (x_out (bs, c, h, w, d), P_logit (bs, 12, 8, h*w*d)).
    """
    del masks  # unused by the reference forward
    bs, c, h, w, d = x_in.shape
    S = h * w * d
    M = bs * S

    # TODO(synk): Bottleneck3D (self.agg, 3 dilated bottleneck blocks) is not in
    # the reference snippet and is treated as identity; when it is implemented,
    # stop folding W1 + W3 below and feed agg(x) as a third resize operand.

    # channels-last flattened voxels (s = hh*w*d + ww*d + dd)
    x_cl = jnp.transpose(x_in, (0, 2, 3, 4, 1)).reshape(M, c)
    x_cl_bf = x_cl.astype(jnp.bfloat16)

    # ---- pred_context_map: 1x1x1 conv, output zero-padded 96 -> 128 ---------
    pred_w = jnp.pad(params["pred_w"], ((0, 0), (0, N_PRED_CH_PAD - N_PRED_CH)))
    pred_b = jnp.pad(params["pred_b"], (0, N_PRED_CH_PAD - N_PRED_CH))
    p_pad = conv1x1(x_cl_bf, pred_w.astype(jnp.bfloat16), pred_b, tm=tm)  # (M, 128) f32
    p_cl = p_pad.reshape(bs, S, N_PRED_CH_PAD)

    # module output: (bs, 12, 8, S); conv channel = class * 8 + position
    P_logit = jnp.transpose(
        p_cl.reshape(bs, S, N_PRED_CH_PAD // N_RELATIVE_POSITIONS,
                     N_RELATIVE_POSITIONS)[:, :, :N_RELATION_CLASSES, :],
        (0, 2, 3, 1))

    # ---- gather-then-softmax -------------------------------------------------
    # softmax(P_logit / T) over the class axis commutes with the (pos, voxel)
    # source gather, so only the K gathered logit rows are softmaxed (f32);
    # the full (bs, 12, 8, S) probability tensor is never materialized.
    # TODO(synk): this tiny (bs, K, 12) softmax stays in plain JAX.
    mp_idx = _stack_index_maps(map_Ps, S)        # (bs, K, 4)
    mc_idx = _stack_index_maps(map_contexts, S)  # (bs, K, 4)
    cls_off = (jnp.arange(N_RELATION_CLASSES, dtype=jnp.int32)[None, :]
               * N_RELATIVE_POSITIONS)

    def _gather_softmax(p_b, mp_b):
        src_voxel = mp_b[:, 0] * (w * d) + mp_b[:, 1] * d + mp_b[:, 2]   # (K,)
        chan = mp_b[:, 3][:, None] + cls_off                              # (K, 12)
        logits = p_b.at[src_voxel[:, None], chan].get(
            mode="fill", fill_value=0.0).astype(jnp.float32)
        logits = logits * (1.0 / TEMPERATURE)
        logits = logits - jnp.max(logits, axis=-1, keepdims=True)
        e = jnp.exp(logits)
        return e / jnp.sum(e, axis=-1, keepdims=True)                     # (K, 12)

    p_vals = jax.vmap(_gather_softmax)(p_cl, mp_idx)                      # (bs, K, 12)

    # ---- x_context: batched scatter, built directly channels-last -----------
    # TODO(synk): duplicate destination indices resolve by unspecified scatter
    # ordering (same caveat as torch advanced-index assignment).
    # TODO(synk): a fully sparse rewrite ((K,12) matmul against W2 rows scattered
    # into the resize output) would avoid this dense (bs*S, 96) array entirely.
    def _scatter_ctx(vals_b, mc_b):
        dst_voxel = mc_b[:, 0] * (w * d) + mc_b[:, 1] * d + mc_b[:, 2]
        chan = mc_b[:, 3][:, None] + cls_off                              # (K, 12)
        xc = jnp.zeros((S, N_PRED_CH), jnp.bfloat16)
        return xc.at[dst_voxel[:, None], chan].set(
            vals_b.astype(jnp.bfloat16), mode="drop")

    x_context_cl = jax.vmap(_scatter_ctx)(p_vals, mc_idx).reshape(M, N_PRED_CH)

    # ---- resize: fused 1x1x1 conv, no concat ---------------------------------
    w1 = params["resize_w"][:c]
    w2 = params["resize_w"][c:c + N_PRED_CH]
    w3 = params["resize_w"][c + N_PRED_CH:]
    w_main = (w1 + w3).astype(jnp.bfloat16)   # agg == identity => x == x_in
    out_cl = resize_conv(x_cl_bf, x_context_cl, w_main,
                         w2.astype(jnp.bfloat16), params["resize_b"], tm=tm)
    x_out = jnp.transpose(out_cl.reshape(bs, h, w, d, c), (0, 4, 1, 2, 3))

    return x_out, P_logit


# ---------------------------------------------------------------------------
# Deterministic parameter construction (synthetic; no checkpoint loading)
# ---------------------------------------------------------------------------
def make_params(key, in_channels):
    n_out = N_PRED_CH                         # 96
    cat_ch = 2 * in_channels + n_out          # == 608 when in_channels == 256
    k1, k2, k3, k4 = jax.random.split(key, 4)
    return {
        # stored as (C_in, C_out) == torch conv weight[:, :, 0, 0, 0].T
        "pred_w": 0.05 * jax.random.normal(k1, (in_channels, n_out), jnp.float32),
        "pred_b": 0.05 * jax.random.normal(k2, (n_out,), jnp.float32),
        "resize_w": 0.05 * jax.random.normal(k3, (cat_ch, in_channels), jnp.float32),
        "resize_b": 0.05 * jax.random.normal(k4, (in_channels,), jnp.float32),
    }


if __name__ == "__main__":
    bs, c, h, w, d = 2, 32, 8, 8, 8
    key = jax.random.PRNGKey(0)
    kx, kp, *kidx = jax.random.split(key, 2 + 8)

    x_in = jax.random.normal(kx, (bs, c, h, w, d), jnp.float32)
    masks = None  # unused by forward
    params = make_params(kp, c)

    # per-batch (K, 4) index maps: columns (h, w, d, relative_position)
    K_idx = 16
    def make_idx(keys):
        cols = [
            jax.random.randint(keys[0], (K_idx,), 0, h),
            jax.random.randint(keys[1], (K_idx,), 0, w),
            jax.random.randint(keys[2], (K_idx,), 0, d),
            jax.random.randint(keys[3], (K_idx,), 0, N_RELATIVE_POSITIONS),
        ]
        return jnp.stack(cols, axis=1).astype(jnp.int32)

    map_contexts = [make_idx(kidx[0:4]), make_idx(kidx[4:8])]
    map_Ps = [make_idx(kidx[4:8]), make_idx(kidx[0:4])]

    fwd = jax.jit(functools.partial(rp_context_prior_forward, params=params))
    x_out, P_logit = fwd(x_in, masks, map_contexts, map_Ps)
    jax.block_until_ready((x_out, P_logit))

    assert x_out.shape == (bs, c, h, w, d)
    assert P_logit.shape == (bs, N_RELATION_CLASSES, N_RELATIVE_POSITIONS, h * w * d)
    print("KERNEL_OK")
</pallas_src>

<mosaic_0001>
module attributes {stable_mosaic.version = 11 : i64} {
  func.func @_matmul_bias_kernel(%arg0: i32, %arg1: memref<1024x32xbf16, #tpu.memory_space<vmem>>, %arg2: memref<32x128xbf16, #tpu.memory_space<vmem>>, %arg3: memref<1x128xf32, #tpu.memory_space<vmem>>, %arg4: memref<1024x128xf32, #tpu.memory_space<vmem>>) attributes {dimension_semantics = [#tpu.dimension_semantics<parallel>], iteration_bounds = array<i64: 1>, scalar_prefetch = 0 : i64, scratch_operands = 0 : i64, tpu.core_type = #tpu.core_type<tc>, window_params = [{transform_indices = @transform_0, window_bounds = array<i64: 1024, 32>}, {pipeline_mode = #tpu.pipeline_mode<synchronous>, transform_indices = @transform_1, window_bounds = array<i64: 32, 128>}, {pipeline_mode = #tpu.pipeline_mode<synchronous>, transform_indices = @transform_2, window_bounds = array<i64: 1, 128>}, {transform_indices = @transform_3, window_bounds = array<i64: 1024, 128>}]} {
    %c0 = arith.constant 0 : index
    %c0_0 = arith.constant 0 : index
    %0 = vector.load %arg1[%c0, %c0_0] : memref<1024x32xbf16, #tpu.memory_space<vmem>>, vector<1024x32xbf16>
    %c0_1 = arith.constant 0 : index
    %c0_2 = arith.constant 0 : index
    %1 = vector.load %arg2[%c0_1, %c0_2] : memref<32x128xbf16, #tpu.memory_space<vmem>>, vector<32x128xbf16>
    %cst = arith.constant dense<0.000000e+00> : vector<1024x128xf32>
    %2 = tpu.matmul %0, %1, %cst {dimension_numbers = #tpu.dot_dimension_numbers<[1], [0], [0], [1], [0, 0, 1, 1], [], []>} : vector<1024x32xbf16>, vector<32x128xbf16>, vector<1024x128xf32> -> vector<1024x128xf32>
    %c0_3 = arith.constant 0 : index
    %c0_4 = arith.constant 0 : index
    %3 = vector.load %arg3[%c0_3, %c0_4] : memref<1x128xf32, #tpu.memory_space<vmem>>, vector<1x128xf32>
    %4 = vector.broadcast %3 : vector<1x128xf32> to vector<1024x128xf32>
    %5 = arith.addf %2, %4 : vector<1024x128xf32>
    %c0_5 = arith.constant 0 : index
    %c0_6 = arith.constant 0 : index
    %6 = vector.load %arg4[%c0_5, %c0_6] : memref<1024x128xf32, #tpu.memory_space<vmem>>, vector<1024x128xf32>
    tpu.vector_store %arg4[%c0_5, %c0_6], %5 {strides = array<i32>} : memref<1024x128xf32, #tpu.memory_space<vmem>>, vector<1024x128xf32>,
    return
  }
  func.func @transform_0(%arg0: i32) -> (i32, i32) {
    %c0_i32 = arith.constant 0 : i32
    %c0_i32_0 = arith.constant 0 : i32
    return %arg0, %c0_i32 : i32, i32
  }
  func.func @transform_1(%arg0: i32) -> (i32, i32) {
    %c0_i32 = arith.constant 0 : i32
    %c0_i32_0 = arith.constant 0 : i32
    %c0_i32_1 = arith.constant 0 : i32
    return %c0_i32, %c0_i32_0 : i32, i32
  }
  func.func @transform_2(%arg0: i32) -> (i32, i32) {
    %c0_i32 = arith.constant 0 : i32
    %c0_i32_0 = arith.constant 0 : i32
    %c0_i32_1 = arith.constant 0 : i32
    return %c0_i32, %c0_i32_0 : i32, i32
  }
  func.func @transform_3(%arg0: i32) -> (i32, i32) {
    %c0_i32 = arith.constant 0 : i32
    %c0_i32_0 = arith.constant 0 : i32
    return %arg0, %c0_i32 : i32, i32
  }
}

module attributes {stable_mosaic.version = 11 : i64} {
  func.func @_resize_kernel(%arg0: i32, %arg1: memref<1024x32xbf16, #tpu.memory_space<vmem>>, %arg2: memref<1024x96xbf16, #tpu.memory_space<vmem>>, %arg3: memref<32x32xbf16, #tpu.memory_space<vmem>>, %arg4: memref<96x32xbf16, #tpu.memory_space<vmem>>, %arg5: memref<1x32xf32, #tpu.memory_space<vmem>>, %arg6: memref<1024x32xf32, #tpu.memory_space<vmem>>) attributes {dimension_semantics = [#tpu.dimension_semantics<parallel>], iteration_bounds = array<i64: 1>, scalar_prefetch = 0 : i64, scratch_operands = 0 : i64, tpu.core_type = #tpu.core_type<tc>, window_params = [{transform_indices = @transform_0, window_bounds = array<i64: 1024, 32>}, {transform_indices = @transform_1, window_bounds = array<i64: 1024, 96>}, {pipeline_mode = #tpu.pipeline_mode<synchronous>, transform_indices = @transform_2, window_bounds = array<i64: 32, 32>}, {pipeline_mode = #tpu.pipeline_mode<synchronous>, transform_indices = @transform_3, window_bounds = array<i64: 96, 32>}, {pipeline_mode = #tpu.pipeline_mode<synchronous>, transform_indices = @transform_4, window_bounds = array<i64: 1, 32>}, {transform_indices = @transform_5, window_bounds = array<i64: 1024, 32>}]} {
    %c0 = arith.constant 0 : index
    %c0_0 = arith.constant 0 : index
    %0 = vector.load %arg1[%c0, %c0_0] : memref<1024x32xbf16, #tpu.memory_space<vmem>>, vector<1024x32xbf16>
    %c0_1 = arith.constant 0 : index
    %c0_2 = arith.constant 0 : index
    %1 = vector.load %arg3[%c0_1, %c0_2] : memref<32x32xbf16, #tpu.memory_space<vmem>>, vector<32x32xbf16>
    %cst = arith.constant dense<0.000000e+00> : vector<1024x32xf32>
    %2 = tpu.matmul %0, %1, %cst {dimension_numbers = #tpu.dot_dimension_numbers<[1], [0], [0], [1], [0, 0, 1, 1], [], []>} : vector<1024x32xbf16>, vector<32x32xbf16>, vector<1024x32xf32> -> vector<1024x32xf32>
    %c0_3 = arith.constant 0 : index
    %c0_4 = arith.constant 0 : index
    %3 = vector.load %arg2[%c0_3, %c0_4] : memref<1024x96xbf16, #tpu.memory_space<vmem>>, vector<1024x96xbf16>
    %c0_5 = arith.constant 0 : index
    %c0_6 = arith.constant 0 : index
    %4 = vector.load %arg4[%c0_5, %c0_6] : memref<96x32xbf16, #tpu.memory_space<vmem>>, vector<96x32xbf16>
    %cst_7 = arith.constant dense<0.000000e+00> : vector<1024x32xf32>
    %5 = tpu.matmul %3, %4, %cst_7 {dimension_numbers = #tpu.dot_dimension_numbers<[1], [0], [0], [1], [0, 0, 1, 1], [], []>} : vector<1024x96xbf16>, vector<96x32xbf16>, vector<1024x32xf32> -> vector<1024x32xf32>
    %6 = arith.addf %2, %5 : vector<1024x32xf32>
    %c0_8 = arith.constant 0 : index
    %c0_9 = arith.constant 0 : index
    %7 = vector.load %arg5[%c0_8, %c0_9] : memref<1x32xf32, #tpu.memory_space<vmem>>, vector<1x32xf32>
    %8 = vector.broadcast %7 : vector<1x32xf32> to vector<1024x32xf32>
    %9 = arith.addf %6, %8 : vector<1024x32xf32>
    %c0_10 = arith.constant 0 : index
    %c0_11 = arith.constant 0 : index
    %10 = vector.load %arg6[%c0_10, %c0_11] : memref<1024x32xf32, #tpu.memory_space<vmem>>, vector<1024x32xf32>
    tpu.vector_store %arg6[%c0_10, %c0_11], %9 {strides = array<i32>} : memref<1024x32xf32, #tpu.memory_space<vmem>>, vector<1024x32xf32>,
    return
  }
  func.func @transform_0(%arg0: i32) -> (i32, i32) {
    %c0_i32 = arith.constant 0 : i32
    %c0_i32_0 = arith.constant 0 : i32
    return %arg0, %c0_i32 : i32, i32
  }
  func.func @transform_1(%arg0: i32) -> (i32, i32) {
    %c0_i32 = arith.constant 0 : i32
    %c0_i32_0 = arith.constant 0 : i32
    return %arg0, %c0_i32 : i32, i32
  }
  func.func @transform_2(%arg0: i32) -> (i32, i32) {
    %c0_i32 = arith.constant 0 : i32
    %c0_i32_0 = arith.constant 0 : i32
    %c0_i32_1 = arith.constant 0 : i32
    return %c0_i32, %c0_i32_0 : i32, i32
  }
  func.func @transform_3(%arg0: i32) -> (i32, i32) {
    %c0_i32 = arith.constant 0 : i32
    %c0_i32_0 = arith.constant 0 : i32
    %c0_i32_1 = arith.constant 0 : i32
    return %c0_i32, %c0_i32_0 : i32, i32
  }
  func.func @transform_4(%arg0: i32) -> (i32, i32) {
    %c0_i32 = arith.constant 0 : i32
    %c0_i32_0 = arith.constant 0 : i32
    %c0_i32_1 = arith.constant 0 : i32
    return %c0_i32, %c0_i32_0 : i32, i32
  }
  func.func @transform_5(%arg0: i32) -> (i32, i32) {
    %c0_i32 = arith.constant 0 : i32
    %c0_i32_0 = arith.constant 0 : i32
    return %arg0, %c0_i32 : i32, i32
  }
}

</mosaic_0001>

<bundles_post_ra>
// kernel: rp_context_prior_forward.2
= control target key start
LH: loop header
LB: loop body
LE: loop exit
PB: predicated region body
PF: predicated region fallthrough
CT: control target
= control target key end

     0   :  { %vm486_vm0 = vcmask 261120   ;;  %s2554_s1 = inlined_call_operand.vmem [shape: bf16[32,128], index: 1, kind: input, shape index: {}]   ;;  %s2555_s0 = inlined_call_operand.vmem [shape: bf16[1024,32], index: 0, kind: input, shape index: {}]   ;;  %s2556_s2 = inlined_call_operand.vmem [shape: f32[1,128], index: 2, kind: input, shape index: {}]   ;;  %s2557_s3 = inlined_call_operand.vmem [shape: f32[1024,128], index: 3, kind: output, shape index: {}]  }
   0x1   :  { %v1689_v0 = vld [vmem:[%s2554_s1] sm:$0xff]   ;;  %v1690_v1 = vld [vmem:[%s2554_s1 + $0x8] sm:$0xff]   ;;  %v1695_v6 = vld [vmem:[%s2555_s0 + $0x10] sm:$0xff]  }
   0x2   :  { %1553 = vmatprep.subr.bf16.mxu0 %v1689_v0  ;;  %1685 = vmatprep.subr.bf16.mxu1 %v1689_v0  ;;  %v1691_v2 = vld [vmem:[%s2555_s0] sm:$0xff]   ;;  %v1693_v4 = vld [vmem:[%s2555_s0 + $0x8] sm:$0xff]   ;;  %v1696_v7 = vld [vmem:[%s2555_s0 + $0x110] sm:$0xff]  }
   0x3   :  { %1554 = vmatpush3.bf16.msra.mxu0 %v1689_v0  ;;  %1687 = vmatpush3.bf16.msra.mxu1 %v1689_v0  ;;  %v1692_v3 = vld [vmem:[%s2555_s0 + $0x100] sm:$0xff]   ;;  %v1694_v5 = vld [vmem:[%s2555_s0 + $0x108] sm:$0xff]   ;;  %v1697_v8 = vld [vmem:[%s2555_s0 + $0x18] sm:$0xff]  }
   0x4   :  { %1555 = vmatprep.subr.bf16.mxu0 %v1690_v1  ;;  %1686 = vmatprep.subr.bf16.mxu1 %v1690_v1  ;;  %v1698_v9 = vld [vmem:[%s2555_s0 + $0x118] sm:$0xff]   ;;  %v1699_v10 = vld [vmem:[%s2555_s0 + $0x20] sm:$0xff]   ;;  %v1701_v12 = vld [vmem:[%s2555_s0 + $0x28] sm:$0xff]  }
   0x5   :  { %1557 = vmatprep.mubr.msk.bf16.mxu0 %vm486_vm0, %v1691_v2  ;;  %1621 = vmatprep.mubr.msk.bf16.mxu1 %vm486_vm0, %v1692_v3  ;;  %v1700_v11 = vld [vmem:[%s2555_s0 + $0x120] sm:$0xff]   ;;  %v1702_v13 = vld [vmem:[%s2555_s0 + $0x128] sm:$0xff]   ;;  %v1703_v14 = vld [vmem:[%s2555_s0 + $0x30] sm:$0xff]  }
   0x6   :  { %v1704_v15 = vld [vmem:[%s2555_s0 + $0x130] sm:$0xff]   ;;  %v1705_v16 = vld [vmem:[%s2555_s0 + $0x38] sm:$0xff]   ;;  %v1707_v18 = vld [vmem:[%s2555_s0 + $0x40] sm:$0xff]  }
   0x7   :  { %1556 = vmatpush3.bf16.msra.mxu0 %v1690_v1  ;;  %1688 = vmatpush3.bf16.msra.mxu1 %v1690_v1  ;;  %v1706_v17 = vld [vmem:[%s2555_s0 + $0x138] sm:$0xff]   ;;  %v1708_v19 = vld [vmem:[%s2555_s0 + $0x140] sm:$0xff]   ;;  %v1709_v20 = vld [vmem:[%s2555_s0 + $0x48] sm:$0xff]  }
   0x8   :  { %v1710_v21 = vld [vmem:[%s2555_s0 + $0x148] sm:$0xff]   ;;  %v1711_v22 = vld [vmem:[%s2555_s0 + $0x50] sm:$0xff]   ;;  %v1713_v24 = vld [vmem:[%s2555_s0 + $0x58] sm:$0xff]  }
   0x9   :  { %v1712_v23 = vld [vmem:[%s2555_s0 + $0x150] sm:$0xff]   ;;  %v1714_v25 = vld [vmem:[%s2555_s0 + $0x158] sm:$0xff]   ;;  %v1715_v26 = vld [vmem:[%s2555_s0 + $0x60] sm:$0xff]  }
   0xa   :  { %1558 = vmatmul.mubr.msk.bf16.vlgmr.msra.gmra.mrb[0].mxu0 %vm486_vm0, %v1693_v4  ;;  %1622 = vmatmul.mubr.msk.bf16.vlgmr.msra.gmra.mrb[0].mxu1 %vm486_vm0, %v1694_v5  ;;  %v1716_v27 = vld [vmem:[%s2555_s0 + $0x160] sm:$0xff]   ;;  %v1717_v28 = vld [vmem:[%s2555_s0 + $0x68] sm:$0xff]   ;;  %v1719_v30 = vld [vmem:[%s2555_s0 + $0x70] sm:$0xff]  }
   0xb   :  { %1561 = vmatprep.mubr.msk.bf16.mxu0 %vm486_vm0, %v1695_v6  ;;  %1625 = vmatprep.mubr.msk.bf16.mxu1 %vm486_vm0, %v1696_v7  ;;  %v1718_v29 = vld [vmem:[%s2555_s0 + $0x168] sm:$0xff]   ;;  %v1720_v31 = vld [vmem:[%s2555_s0 + $0x170] sm:$0xff]   ;;  %v1721_v32 = vld [vmem:[%s2555_s0 + $0x78] sm:$0xff]  }
   0xc   :  { %v1722_v33 = vld [vmem:[%s2555_s0 + $0x178] sm:$0xff]   ;;  %v1723_v34 = vld [vmem:[%s2555_s0 + $0x80] sm:$0xff]   ;;  %v1725_v36 = vld [vmem:[%s2555_s0 + $0x88] sm:$0xff]  }
   0xd   :  { %v1724_v35 = vld [vmem:[%s2555_s0 + $0x180] sm:$0xff]   ;;  %v1726_v37 = vld [vmem:[%s2555_s0 + $0x188] sm:$0xff]   ;;  %v1727_v38 = vld [vmem:[%s2555_s0 + $0x90] sm:$0xff]  }
   0xe   :  { %v1728_v39 = vld [vmem:[%s2555_s0 + $0x190] sm:$0xff]   ;;  %v1729_v40 = vld [vmem:[%s2555_s0 + $0x98] sm:$0xff]   ;;  %v1731_v42 = vld [vmem:[%s2555_s0 + $0xa0] sm:$0xff]  }
   0xf   :  { %v1730_v41 = vld [vmem:[%s2555_s0 + $0x198] sm:$0xff]   ;;  %v1732_v43 = vld [vmem:[%s2555_s0 + $0x1a0] sm:$0xff]   ;;  %v1733_v44 = vld [vmem:[%s2555_s0 + $0xa8] sm:$0xff]  }
  0x10   :  { %v1734_v45 = vld [vmem:[%s2555_s0 + $0x1a8] sm:$0xff]   ;;  %v1735_v46 = vld [vmem:[%s2555_s0 + $0xb0] sm:$0xff]   ;;  %v1737_v48 = vld [vmem:[%s2555_s0 + $0xb8] sm:$0xff]  }
  0x11   :  { %v1736_v47 = vld [vmem:[%s2555_s0 + $0x1b0] sm:$0xff]   ;;  %v1738_v49 = vld [vmem:[%s2555_s0 + $0x1b8] sm:$0xff]   ;;  %v1739_v50 = vld [vmem:[%s2555_s0 + $0xc0] sm:$0xff]  }
  0x12   :  { %1562 = vmatmul.mubr.msk.bf16.gmra.mrb[4].mxu0 %vm486_vm0, %v1697_v8  ;;  %1626 = vmatmul.mubr.msk.bf16.gmra.mrb[4].mxu1 %vm486_vm0, %v1698_v9  ;;  %v1740_v51 = vld [vmem:[%s2555_s0 + $0x1c0] sm:$0xff]   ;;  %v1741_v52 = vld [vmem:[%s2555_s0 + $0xc8] sm:$0xff]   ;;  %v1743_v54 = vld [vmem:[%s2555_s0 + $0xd0] sm:$0xff]  }
  0x13   :  { %1565 = vmatprep.mubr.msk.bf16.mxu0 %vm486_vm0, %v1699_v10  ;;  %1629 = vmatprep.mubr.msk.bf16.mxu1 %vm486_vm0, %v1700_v11  ;;  %v1742_v53 = vld [vmem:[%s2555_s0 + $0x1c8] sm:$0xff]   ;;  %v1744_v55 = vld [vmem:[%s2555_s0 + $0x1d0] sm:$0xff]   ;;  %v1745_v56 = vld [vmem:[%s2555_s0 + $0xd8] sm:$0xff]  }
  0x14   :  { %v1746_v57 = vld [vmem:[%s2555_s0 + $0x1d8] sm:$0xff]   ;;  %v1747_v58 = vld [vmem:[%s2555_s0 + $0xe0] sm:$0xff]   ;;  %v1749_v60 = vld [vmem:[%s2555_s0 + $0xe8] sm:$0xff]  }
  0x15   :  { %v1748_v59 = vld [vmem:[%s2555_s0 + $0x1e0] sm:$0xff]   ;;  %v1750_v61 = vld [vmem:[%s2555_s0 + $0x1e8] sm:$0xff]   ;;  %v1751_v62 = vld [vmem:[%s2555_s0 + $0xf0] sm:$0xff]  }
  0x16   :  { %v1752_v63 = vld [vmem:[%s2555_s0 + $0x1f0] sm:$0xff]   ;;  %v1753_v0 = vld [vmem:[%s2555_s0 + $0xf8] sm:$0xff]   ;;  %v2040_v2 = vld [vmem:[%s2556_s2] ss:$0 sm:$0xff] }
  0x17   :  { %v1754_v1 = vld [vmem:[%s2555_s0 + $0x1f8] sm:$0xff]  }
  0x1a   :  { %1566 = vmatmul.mubr.msk.bf16.gmra.mrb[8].mxu0 %vm486_vm0, %v1701_v12  ;;  %1630 = vmatmul.mubr.msk.bf16.gmra.mrb[8].mxu1 %vm486_vm0, %v1702_v13 }
  0x1b   :  { %1569 = vmatprep.mubr.msk.bf16.mxu0 %vm486_vm0, %v1703_v14  ;;  %1633 = vmatprep.mubr.msk.bf16.mxu1 %vm486_vm0, %v1704_v15 }
  0x22   :  { %1570 = vmatmul.mubr.msk.bf16.gmra.mrb[12].mxu0 %vm486_vm0, %v1705_v16  ;;  %1634 = vmatmul.mubr.msk.bf16.gmra.mrb[12].mxu1 %vm486_vm0, %v1706_v17 }
  0x23   :  { %1573 = vmatprep.mubr.msk.bf16.mxu0 %vm486_vm0, %v1707_v18  ;;  %1637 = vmatprep.mubr.msk.bf16.mxu1 %vm486_vm0, %v1708_v19 }
  0x2a   :  { %1574 = vmatmul.mubr.msk.bf16.gmra.mrb[16].mxu0 %vm486_vm0, %v1709_v20  ;;  %1638 = vmatmul.mubr.msk.bf16.gmra.mrb[16].mxu1 %vm486_vm0, %v1710_v21 }
  0x2b   :  { %1577 = vmatprep.mubr.msk.bf16.mxu0 %vm486_vm0, %v1711_v22  ;;  %1641 = vmatprep.mubr.msk.bf16.mxu1 %vm486_vm0, %v1712_v23 }
  0x32   :  { %1578 = vmatmul.mubr.msk.bf16.gmra.mrb[20].mxu0 %vm486_vm0, %v1713_v24  ;;  %1642 = vmatmul.mubr.msk.bf16.gmra.mrb[20].mxu1 %vm486_vm0, %v1714_v25 }
  0x33   :  { %1581 = vmatprep.mubr.msk.bf16.mxu0 %vm486_vm0, %v1715_v26  ;;  %1645 = vmatprep.mubr.msk.bf16.mxu1 %vm486_vm0, %v1716_v27 }
  0x3a   :  { %1582 = vmatmul.mubr.msk.bf16.gmra.mrb[24].mxu0 %vm486_vm0, %v1717_v28  ;;  %1646 = vmatmul.mubr.msk.bf16.gmra.mrb[24].mxu1 %vm486_vm0, %v1718_v29 }
  0x3b   :  { %1585 = vmatprep.mubr.msk.bf16.mxu0 %vm486_vm0, %v1719_v30  ;;  %1649 = vmatprep.mubr.msk.bf16.mxu1 %vm486_vm0, %v1720_v31 }
  0x42   :  { %1586 = vmatmul.mubr.msk.bf16.gmra.mrb[28].mxu0 %vm486_vm0, %v1721_v32  ;;  %1650 = vmatmul.mubr.msk.bf16.gmra.mrb[28].mxu1 %vm486_vm0, %v1722_v33 }
  0x43   :  { %1589 = vmatprep.mubr.msk.bf16.mxu0 %vm486_vm0, %v1723_v34  ;;  %1653 = vmatprep.mubr.msk.bf16.mxu1 %vm486_vm0, %v1724_v35 }
  0x4a   :  { %1590 = vmatmul.mubr.msk.bf16.gmra.mrb[32].mxu0 %vm486_vm0, %v1725_v36  ;;  %1654 = vmatmul.mubr.msk.bf16.gmra.mrb[32].mxu1 %vm486_vm0, %v1726_v37 }
  0x4b   :  { %1593 = vmatprep.mubr.msk.bf16.mxu0 %vm486_vm0, %v1727_v38  ;;  %1657 = vmatprep.mubr.msk.bf16.mxu1 %vm486_vm0, %v1728_v39 }
  0x52   :  { %1594 = vmatmul.mubr.msk.bf16.gmra.mrb[36].mxu0 %vm486_vm0, %v1729_v40  ;;  %1658 = vmatmul.mubr.msk.bf16.gmra.mrb[36].mxu1 %vm486_vm0, %v1730_v41 }
  0x53   :  { %1597 = vmatprep.mubr.msk.bf16.mxu0 %vm486_vm0, %v1731_v42  ;;  %1661 = vmatprep.mubr.msk.bf16.mxu1 %vm486_vm0, %v1732_v43 }
  0x5a   :  { %1598 = vmatmul.mubr.msk.bf16.gmra.mrb[40].mxu0 %vm486_vm0, %v1733_v44  ;;  %1662 = vmatmul.mubr.msk.bf16.gmra.mrb[40].mxu1 %vm486_vm0, %v1734_v45 }
  0x5b   :  { %1601 = vmatprep.mubr.msk.bf16.mxu0 %vm486_vm0, %v1735_v46  ;;  %1665 = vmatprep.mubr.msk.bf16.mxu1 %vm486_vm0, %v1736_v47 }
  0x62   :  { %1602 = vmatmul.mubr.msk.bf16.gmra.mrb[44].mxu0 %vm486_vm0, %v1737_v48  ;;  %1666 = vmatmul.mubr.msk.bf16.gmra.mrb[44].mxu1 %vm486_vm0, %v1738_v49 }
  0x63   :  { %1605 = vmatprep.mubr.msk.bf16.mxu0 %vm486_vm0, %v1739_v50  ;;  %1669 = vmatprep.mubr.msk.bf16.mxu1 %vm486_vm0, %v1740_v51 }
  0x6a   :  { %1606 = vmatmul.mubr.msk.bf16.gmra.mrb[48].mxu0 %vm486_vm0, %v1741_v52  ;;  %1670 = vmatmul.mubr.msk.bf16.gmra.mrb[48].mxu1 %vm486_vm0, %v1742_v53 }
  0x6b   :  { %1609 = vmatprep.mubr.msk.bf16.mxu0 %vm486_vm0, %v1743_v54  ;;  %1673 = vmatprep.mubr.msk.bf16.mxu1 %vm486_vm0, %v1744_v55 }
  0x72   :  { %1610 = vmatmul.mubr.msk.bf16.gmra.mrb[52].mxu0 %vm486_vm0, %v1745_v56  ;;  %1674 = vmatmul.mubr.msk.bf16.gmra.mrb[52].mxu1 %vm486_vm0, %v1746_v57 }
  0x73   :  { %1613 = vmatprep.mubr.msk.bf16.mxu0 %vm486_vm0, %v1747_v58  ;;  %1677 = vmatprep.mubr.msk.bf16.mxu1 %vm486_vm0, %v1748_v59 }
  0x7a   :  { %1614 = vmatmul.mubr.msk.bf16.gmra.mrb[56].mxu0 %vm486_vm0, %v1749_v60  ;;  %1678 = vmatmul.mubr.msk.bf16.gmra.mrb[56].mxu1 %vm486_vm0, %v1750_v61 }
  0x7b   :  { %1617 = vmatprep.mubr.msk.bf16.mxu0 %vm486_vm0, %v1751_v62  ;;  %1681 = vmatprep.mubr.msk.bf16.mxu1 %vm486_vm0, %v1752_v63 }
  0x82   :  { %1618 = vmatmul.mubr.msk.bf16.gmra.mrb[60].mxu0 %vm486_vm0, %v1753_v0  ;;  %1682 = vmatmul.mubr.msk.bf16.gmra.mrb[60].mxu1 %vm486_vm0, %v1754_v1 }
  0xdd   :  { %v1559_v3 = vpop.f32.mrb[0].mxu0  ;;  %v1623_v4 = vpop.f32.mrb[0].mxu1 }
  0xde   :  { %v722_v5 = vadd.f32 %v1559_v3, %v2040_v2  ;;  %v978_v6 = vadd.f32 %v1623_v4, %v2040_v2  ;;  %v713_v7 = vpop.f32.mrb[1].mxu0  ;;  %v969_v8 = vpop.f32.mrb[1].mxu1 }
  0xdf   :  { %v714_v9 = vadd.f32 %v2040_v2, %v713_v7  ;;  %v970_v10 = vadd.f32 %v2040_v2, %v969_v8  ;;  %v1560_v11 = vpop.f32.mrb[2].mxu0  ;;  %v1624_v12 = vpop.f32.mrb[2].mxu1 }
  0xe0   :  { %1226 = vst [vmem:[%s2557_s3 + $0x10] sm:$0xff] %v722_v5  ;;  %1290 = vst [vmem:[%s2557_s3 + $0x210] sm:$0xff] %v978_v6  ;;  %v725_v13 = vadd.f32 %v1560_v11, %v2040_v2  ;;  %v981_v14 = vadd.f32 %v1624_v12, %v2040_v2  ;;  %v716_v15 = vpop.f32.mrb[3].mxu0  ;;  %v972_v16 = vpop.f32.mrb[3].mxu1 }
  0xe1   :  { %1224 = vst [vmem:[%s2557_s3] sm:$0xff] %v714_v9  ;;  %1288 = vst [vmem:[%s2557_s3 + $0x200] sm:$0xff] %v970_v10  ;;  %v717_v17 = vadd.f32 %v2040_v2, %v716_v15  ;;  %v973_v18 = vadd.f32 %v2040_v2, %v972_v16 }
  0xe2   :  { %1227 = vst [vmem:[%s2557_s3 + $0x18] sm:$0xff] %v725_v13  ;;  %1291 = vst [vmem:[%s2557_s3 + $0x218] sm:$0xff] %v981_v14 }
  0xe3   :  { %1225 = vst [vmem:[%s2557_s3 + $0x8] sm:$0xff] %v717_v17  ;;  %1289 = vst [vmem:[%s2557_s3 + $0x208] sm:$0xff] %v973_v18 }
  0xe5   :  { %v1563_v19 = vpop.f32.mrb[4].mxu0  ;;  %v1627_v20 = vpop.f32.mrb[4].mxu1 }
  0xe6   :  { %v738_v21 = vadd.f32 %v1563_v19, %v2040_v2  ;;  %v994_v22 = vadd.f32 %v1627_v20, %v2040_v2  ;;  %v729_v23 = vpop.f32.mrb[5].mxu0  ;;  %v985_v24 = vpop.f32.mrb[5].mxu1 }
  0xe7   :  { %v730_v25 = vadd.f32 %v2040_v2, %v729_v23  ;;  %v986_v26 = vadd.f32 %v2040_v2, %v985_v24  ;;  %v1564_v27 = vpop.f32.mrb[6].mxu0  ;;  %v1628_v28 = vpop.f32.mrb[6].mxu1 }
  0xe8   :  { %1230 = vst [vmem:[%s2557_s3 + $0x30] sm:$0xff] %v738_v21  ;;  %1294 = vst [vmem:[%s2557_s3 + $0x230] sm:$0xff] %v994_v22  ;;  %v741_v29 = vadd.f32 %v1564_v27, %v2040_v2  ;;  %v997_v30 = vadd.f32 %v1628_v28, %v2040_v2  ;;  %v732_v31 = vpop.f32.mrb[7].mxu0  ;;  %v988_v32 = vpop.f32.mrb[7].mxu1 }
  0xe9   :  { %1228 = vst [vmem:[%s2557_s3 + $0x20] sm:$0xff] %v730_v25  ;;  %1292 = vst [vmem:[%s2557_s3 + $0x220] sm:$0xff] %v986_v26  ;;  %v733_v33 = vadd.f32 %v2040_v2, %v732_v31  ;;  %v989_v34 = vadd.f32 %v2040_v2, %v988_v32 }
  0xea   :  { %1231 = vst [vmem:[%s2557_s3 + $0x38] sm:$0xff] %v741_v29  ;;  %1295 = vst [vmem:[%s2557_s3 + $0x238] sm:$0xff] %v997_v30 }
  0xeb   :  { %1229 = vst [vmem:[%s2557_s3 + $0x28] sm:$0xff] %v733_v33  ;;  %1293 = vst [vmem:[%s2557_s3 + $0x228] sm:$0xff] %v989_v34 }
  0xed   :  { %v1567_v35 = vpop.f32.mrb[8].mxu0  ;;  %v1631_v36 = vpop.f32.mrb[8].mxu1 }
  0xee   :  { %v754_v37 = vadd.f32 %v1567_v35, %v2040_v2  ;;  %v1010_v38 = vadd.f32 %v1631_v36, %v2040_v2  ;;  %v745_v39 = vpop.f32.mrb[9].mxu0  ;;  %v1001_v40 = vpop.f32.mrb[9].mxu1 }
  0xef   :  { %v746_v41 = vadd.f32 %v2040_v2, %v745_v39  ;;  %v1002_v42 = vadd.f32 %v2040_v2, %v1001_v40  ;;  %v1568_v43 = vpop.f32.mrb[10].mxu0  ;;  %v1632_v44 = vpop.f32.mrb[10].mxu1 }
  0xf0   :  { %1234 = vst [vmem:[%s2557_s3 + $0x50] sm:$0xff] %v754_v37  ;;  %1298 = vst [vmem:[%s2557_s3 + $0x250] sm:$0xff] %v1010_v38  ;;  %v757_v45 = vadd.f32 %v1568_v43, %v2040_v2  ;;  %v1013_v46 = vadd.f32 %v1632_v44, %v2040_v2  ;;  %v748_v47 = vpop.f32.mrb[11].mxu0  ;;  %v1004_v48 = vpop.f32.mrb[11].mxu1 }
  0xf1   :  { %1232 = vst [vmem:[%s2557_s3 + $0x40] sm:$0xff] %v746_v41  ;;  %1296 = vst [vmem:[%s2557_s3 + $0x240] sm:$0xff] %v1002_v42  ;;  %v749_v49 = vadd.f32 %v2040_v2, %v748_v47  ;;  %v1005_v50 = vadd.f32 %v2040_v2, %v1004_v48 }
  0xf2   :  { %1235 = vst [vmem:[%s2557_s3 + $0x58] sm:$0xff] %v757_v45  ;;  %1299 = vst [vmem:[%s2557_s3 + $0x258] sm:$0xff] %v1013_v46 }
  0xf3   :  { %1233 = vst [vmem:[%s2557_s3 + $0x48] sm:$0xff] %v749_v49  ;;  %1297 = vst [vmem:[%s2557_s3 + $0x248] sm:$0xff] %v1005_v50 }
  0xf5   :  { %v1571_v51 = vpop.f32.mrb[12].mxu0  ;;  %v1635_v52 = vpop.f32.mrb[12].mxu1 }
  0xf6   :  { %v770_v53 = vadd.f32 %v1571_v51, %v2040_v2  ;;  %v1026_v54 = vadd.f32 %v1635_v52, %v2040_v2  ;;  %v761_v55 = vpop.f32.mrb[13].mxu0  ;;  %v1017_v56 = vpop.f32.mrb[13].mxu1 }
  0xf7   :  { %v762_v57 = vadd.f32 %v2040_v2, %v761_v55  ;;  %v1018_v58 = vadd.f32 %v2040_v2, %v1017_v56  ;;  %v1572_v59 = vpop.f32.mrb[14].mxu0  ;;  %v1636_v60 = vpop.f32.mrb[14].mxu1 }
  0xf8   :  { %1238 = vst [vmem:[%s2557_s3 + $0x70] sm:$0xff] %v770_v53  ;;  %1302 = vst [vmem:[%s2557_s3 + $0x270] sm:$0xff] %v1026_v54  ;;  %v773_v61 = vadd.f32 %v1572_v59, %v2040_v2  ;;  %v1029_v62 = vadd.f32 %v1636_v60, %v2040_v2  ;;  %v764_v63 = vpop.f32.mrb[15].mxu0  ;;  %v1020_v0 = vpop.f32.mrb[15].mxu1 }
  0xf9   :  { %1236 = vst [vmem:[%s2557_s3 + $0x60] sm:$0xff] %v762_v57  ;;  %1300 = vst [vmem:[%s2557_s3 + $0x260] sm:$0xff] %v1018_v58  ;;  %v765_v1 = vadd.f32 %v2040_v2, %v764_v63  ;;  %v1021_v3 = vadd.f32 %v2040_v2, %v1020_v0 }
  0xfa   :  { %1239 = vst [vmem:[%s2557_s3 + $0x78] sm:$0xff] %v773_v61  ;;  %1303 = vst [vmem:[%s2557_s3 + $0x278] sm:$0xff] %v1029_v62 }
  0xfb   :  { %1237 = vst [vmem:[%s2557_s3 + $0x68] sm:$0xff] %v765_v1  ;;  %1301 = vst [vmem:[%s2557_s3 + $0x268] sm:$0xff] %v1021_v3 }
  0xfd   :  { %v1575_v4 = vpop.f32.mrb[16].mxu0  ;;  %v1639_v5 = vpop.f32.mrb[16].mxu1 }
  0xfe   :  { %v786_v6 = vadd.f32 %v1575_v4, %v2040_v2  ;;  %v1042_v7 = vadd.f32 %v1639_v5, %v2040_v2  ;;  %v777_v8 = vpop.f32.mrb[17].mxu0  ;;  %v1033_v9 = vpop.f32.mrb[17].mxu1 }
  0xff   :  { %v778_v10 = vadd.f32 %v2040_v2, %v777_v8  ;;  %v1034_v11 = vadd.f32 %v2040_v2, %v1033_v9  ;;  %v1576_v12 = vpop.f32.mrb[18].mxu0  ;;  %v1640_v13 = vpop.f32.mrb[18].mxu1 }
 0x100   :  { %1242 = vst [vmem:[%s2557_s3 + $0x90] sm:$0xff] %v786_v6  ;;  %1306 = vst [vmem:[%s2557_s3 + $0x290] sm:$0xff] %v1042_v7  ;;  %v789_v14 = vadd.f32 %v1576_v12, %v2040_v2  ;;  %v1045_v15 = vadd.f32 %v1640_v13, %v2040_v2  ;;  %v780_v16 = vpop.f32.mrb[19].mxu0  ;;  %v1036_v17 = vpop.f32.mrb[19].mxu1 }
 0x101   :  { %1240 = vst [vmem:[%s2557_s3 + $0x80] sm:$0xff] %v778_v10  ;;  %1304 = vst [vmem:[%s2557_s3 + $0x280] sm:$0xff] %v1034_v11  ;;  %v781_v18 = vadd.f32 %v2040_v2, %v780_v16  ;;  %v1037_v19 = vadd.f32 %v2040_v2, %v1036_v17 }
 0x102   :  { %1243 = vst [vmem:[%s2557_s3 + $0x98] sm:$0xff] %v789_v14  ;;  %1307 = vst [vmem:[%s2557_s3 + $0x298] sm:$0xff] %v1045_v15 }
 0x103   :  { %1241 = vst [vmem:[%s2557_s3 + $0x88] sm:$0xff] %v781_v18  ;;  %1305 = vst [vmem:[%s2557_s3 + $0x288] sm:$0xff] %v1037_v19 }
 0x105   :  { %v1579_v20 = vpop.f32.mrb[20].mxu0  ;;  %v1643_v21 = vpop.f32.mrb[20].mxu1 }
 0x106   :  { %v802_v22 = vadd.f32 %v1579_v20, %v2040_v2  ;;  %v1058_v23 = vadd.f32 %v1643_v21, %v2040_v2  ;;  %v793_v24 = vpop.f32.mrb[21].mxu0  ;;  %v1049_v25 = vpop.f32.mrb[21].mxu1 }
 0x107   :  { %v794_v26 = vadd.f32 %v2040_v2, %v793_v24  ;;  %v1050_v27 = vadd.f32 %v2040_v2, %v1049_v25  ;;  %v1580_v28 = vpop.f32.mrb[22].mxu0  ;;  %v1644_v29 = vpop.f32.mrb[22].mxu1 }
 0x108   :  { %1246 = vst [vmem:[%s2557_s3 + $0xb0] sm:$0xff] %v802_v22  ;;  %1310 = vst [vmem:[%s2557_s3 + $0x2b0] sm:$0xff] %v1058_v23  ;;  %v805_v30 = vadd.f32 %v1580_v28, %v2040_v2  ;;  %v1061_v31 = vadd.f32 %v1644_v29, %v2040_v2  ;;  %v796_v32 = vpop.f32.mrb[23].mxu0  ;;  %v1052_v33 = vpop.f32.mrb[23].mxu1 }
 0x109   :  { %1244 = vst [vmem:[%s2557_s3 + $0xa0] sm:$0xff] %v794_v26  ;;  %1308 = vst [vmem:[%s2557_s3 + $0x2a0] sm:$0xff] %v1050_v27  ;;  %v797_v34 = vadd.f32 %v2040_v2, %v796_v32  ;;  %v1053_v35 = vadd.f32 %v2040_v2, %v1052_v33 }
 0x10a   :  { %1247 = vst [vmem:[%s2557_s3 + $0xb8] sm:$0xff] %v805_v30  ;;  %1311 = vst [vmem:[%s2557_s3 + $0x2b8] sm:$0xff] %v1061_v31 }
 0x10b   :  { %1245 = vst [vmem:[%s2557_s3 + $0xa8] sm:$0xff] %v797_v34  ;;  %1309 = vst [vmem:[%s2557_s3 + $0x2a8] sm:$0xff] %v1053_v35 }
 0x10d   :  { %v1583_v36 = vpop.f32.mrb[24].mxu0  ;;  %v1647_v37 = vpop.f32.mrb[24].mxu1 }
 0x10e   :  { %v818_v38 = vadd.f32 %v1583_v36, %v2040_v2  ;;  %v1074_v39 = vadd.f32 %v1647_v37, %v2040_v2  ;;  %v809_v40 = vpop.f32.mrb[25].mxu0  ;;  %v1065_v41 = vpop.f32.mrb[25].mxu1 }
 0x10f   :  { %v810_v42 = vadd.f32 %v2040_v2, %v809_v40  ;;  %v1066_v43 = vadd.f32 %v2040_v2, %v1065_v41  ;;  %v1584_v44 = vpop.f32.mrb[26].mxu0  ;;  %v1648_v45 = vpop.f32.mrb[26].mxu1 }
 0x110   :  { %1250 = vst [vmem:[%s2557_s3 + $0xd0] sm:$0xff] %v818_v38  ;;  %1314 = vst [vmem:[%s2557_s3 + $0x2d0] sm:$0xff] %v1074_v39  ;;  %v821_v46 = vadd.f32 %v1584_v44, %v2040_v2  ;;  %v1077_v47 = vadd.f32 %v1648_v45, %v2040_v2  ;;  %v812_v48 = vpop.f32.mrb[27].mxu0  ;;  %v1068_v49 = vpop.f32.mrb[27].mxu1 }
 0x111   :  { %1248 = vst [vmem:[%s2557_s3 + $0xc0] sm:$0xff] %v810_v42  ;;  %1312 = vst [vmem:[%s2557_s3 + $0x2c0] sm:$0xff] %v1066_v43  ;;  %v813_v50 = vadd.f32 %v2040_v2, %v812_v48  ;;  %v1069_v51 = vadd.f32 %v2040_v2, %v1068_v49 }
 0x112   :  { %1251 = vst [vmem:[%s2557_s3 + $0xd8] sm:$0xff] %v821_v46  ;;  %1315 = vst [vmem:[%s2557_s3 + $0x2d8] sm:$0xff] %v1077_v47 }
 0x113   :  { %1249 = vst [vmem:[%s2557_s3 + $0xc8] sm:$0xff] %v813_v50  ;;  %1313 = vst [vmem:[%s2557_s3 + $0x2c8] sm:$0xff] %v1069_v51 }
 0x115   :  { %v1587_v52 = vpop.f32.mrb[28].mxu0  ;;  %v1651_v53 = vpop.f32.mrb[28].mxu1 }
 0x116   :  { %v834_v54 = vadd.f32 %v1587_v52, %v2040_v2  ;;  %v1090_v55 = vadd.f32 %v1651_v53, %v2040_v2  ;;  %v825_v56 = vpop.f32.mrb[29].mxu0  ;;  %v1081_v57 = vpop.f32.mrb[29].mxu1 }
 0x117   :  { %v826_v58 = vadd.f32 %v2040_v2, %v825_v56  ;;  %v1082_v59 = vadd.f32 %v2040_v2, %v1081_v57  ;;  %v1588_v60 = vpop.f32.mrb[30].mxu0  ;;  %v1652_v61 = vpop.f32.mrb[30].mxu1 }
 0x118   :  { %1254 = vst [vmem:[%s2557_s3 + $0xf0] sm:$0xff] %v834_v54  ;;  %1318 = vst [vmem:[%s2557_s3 + $0x2f0] sm:$0xff] %v1090_v55  ;;  %v837_v62 = vadd.f32 %v1588_v60, %v2040_v2  ;;  %v1093_v63 = vadd.f32 %v1652_v61, %v2040_v2  ;;  %v828_v0 = vpop.f32.mrb[31].mxu0  ;;  %v1084_v1 = vpop.f32.mrb[31].mxu1 }
 0x119   :  { %1252 = vst [vmem:[%s2557_s3 + $0xe0] sm:$0xff] %v826_v58  ;;  %1316 = vst [vmem:[%s2557_s3 + $0x2e0] sm:$0xff] %v1082_v59  ;;  %v829_v3 = vadd.f32 %v2040_v2, %v828_v0  ;;  %v1085_v4 = vadd.f32 %v2040_v2, %v1084_v1 }
 0x11a   :  { %1255 = vst [vmem:[%s2557_s3 + $0xf8] sm:$0xff] %v837_v62  ;;  %1319 = vst [vmem:[%s2557_s3 + $0x2f8] sm:$0xff] %v1093_v63 }
 0x11b   :  { %1253 = vst [vmem:[%s2557_s3 + $0xe8] sm:$0xff] %v829_v3  ;;  %1317 = vst [vmem:[%s2557_s3 + $0x2e8] sm:$0xff] %v1085_v4 }
 0x11d   :  { %v1591_v5 = vpop.f32.mrb[32].mxu0  ;;  %v1655_v6 = vpop.f32.mrb[32].mxu1 }
 0x11e   :  { %v850_v7 = vadd.f32 %v1591_v5, %v2040_v2  ;;  %v1106_v8 = vadd.f32 %v1655_v6, %v2040_v2  ;;  %v841_v9 = vpop.f32.mrb[33].mxu0  ;;  %v1097_v10 = vpop.f32.mrb[33].mxu1 }
 0x11f   :  { %v842_v11 = vadd.f32 %v2040_v2, %v841_v9  ;;  %v1098_v12 = vadd.f32 %v2040_v2, %v1097_v10  ;;  %v1592_v13 = vpop.f32.mrb[34].mxu0  ;;  %v1656_v14 = vpop.f32.mrb[34].mxu1 }
 0x120   :  { %1258 = vst [vmem:[%s2557_s3 + $0x110] sm:$0xff] %v850_v7  ;;  %1322 = vst [vmem:[%s2557_s3 + $0x310] sm:$0xff] %v1106_v8  ;;  %v853_v15 = vadd.f32 %v1592_v13, %v2040_v2  ;;  %v1109_v16 = vadd.f32 %v1656_v14, %v2040_v2  ;;  %v844_v17 = vpop.f32.mrb[35].mxu0  ;;  %v1100_v18 = vpop.f32.mrb[35].mxu1 }
 0x121   :  { %1256 = vst [vmem:[%s2557_s3 + $0x100] sm:$0xff] %v842_v11  ;;  %1320 = vst [vmem:[%s2557_s3 + $0x300] sm:$0xff] %v1098_v12  ;;  %v845_v19 = vadd.f32 %v2040_v2, %v844_v17  ;;  %v1101_v20 = vadd.f32 %v2040_v2, %v1100_v18 }
 0x122   :  { %1259 = vst [vmem:[%s2557_s3 + $0x118] sm:$0xff] %v853_v15  ;;  %1323 = vst [vmem:[%s2557_s3 + $0x318] sm:$0xff] %v1109_v16 }
 0x123   :  { %1257 = vst [vmem:[%s2557_s3 + $0x108] sm:$0xff] %v845_v19  ;;  %1321 = vst [vmem:[%s2557_s3 + $0x308] sm:$0xff] %v1101_v20 }
 0x125   :  { %v1595_v21 = vpop.f32.mrb[36].mxu0  ;;  %v1659_v22 = vpop.f32.mrb[36].mxu1 }
 0x126   :  { %v866_v23 = vadd.f32 %v1595_v21, %v2040_v2  ;;  %v1122_v24 = vadd.f32 %v1659_v22, %v2040_v2  ;;  %v857_v25 = vpop.f32.mrb[37].mxu0  ;;  %v1113_v26 = vpop.f32.mrb[37].mxu1 }
 0x127   :  { %v858_v27 = vadd.f32 %v2040_v2, %v857_v25  ;;  %v1114_v28 = vadd.f32 %v2040_v2, %v1113_v26  ;;  %v1596_v29 = vpop.f32.mrb[38].mxu0  ;;  %v1660_v30 = vpop.f32.mrb[38].mxu1 }
 0x128   :  { %1262 = vst [vmem:[%s2557_s3 + $0x130] sm:$0xff] %v866_v23  ;;  %1326 = vst [vmem:[%s2557_s3 + $0x330] sm:$0xff] %v1122_v24  ;;  %v869_v31 = vadd.f32 %v1596_v29, %v2040_v2  ;;  %v1125_v32 = vadd.f32 %v1660_v30, %v2040_v2  ;;  %v860_v33 = vpop.f32.mrb[39].mxu0  ;;  %v1116_v34 = vpop.f32.mrb[39].mxu1 }
 0x129   :  { %1260 = vst [vmem:[%s2557_s3 + $0x120] sm:$0xff] %v858_v27  ;;  %1324 = vst [vmem:[%s2557_s3 + $0x320] sm:$0xff] %v1114_v28  ;;  %v861_v35 = vadd.f32 %v2040_v2, %v860_v33  ;;  %v1117_v36 = vadd.f32 %v2040_v2, %v1116_v34 }
 0x12a   :  { %1263 = vst [vmem:[%s2557_s3 + $0x138] sm:$0xff] %v869_v31  ;;  %1327 = vst [vmem:[%s2557_s3 + $0x338] sm:$0xff] %v1125_v32 }
 0x12b   :  { %1261 = vst [vmem:[%s2557_s3 + $0x128] sm:$0xff] %v861_v35  ;;  %1325 = vst [vmem:[%s2557_s3 + $0x328] sm:$0xff] %v1117_v36 }
 0x12d   :  { %v1599_v37 = vpop.f32.mrb[40].mxu0  ;;  %v1663_v38 = vpop.f32.mrb[40].mxu1 }
 0x12e   :  { %v882_v39 = vadd.f32 %v1599_v37, %v2040_v2  ;;  %v1138_v40 = vadd.f32 %v1663_v38, %v2040_v2  ;;  %v873_v41 = vpop.f32.mrb[41].mxu0  ;;  %v1129_v42 = vpop.f32.mrb[41].mxu1 }
 0x12f   :  { %v874_v43 = vadd.f32 %v2040_v2, %v873_v41  ;;  %v1130_v44 = vadd.f32 %v2040_v2, %v1129_v42  ;;  %v1600_v45 = vpop.f32.mrb[42].mxu0  ;;  %v1664_v46 = vpop.f32.mrb[42].mxu1 }
 0x130   :  { %1266 = vst [vmem:[%s2557_s3 + $0x150] sm:$0xff] %v882_v39  ;;  %1330 = vst [vmem:[%s2557_s3 + $0x350] sm:$0xff] %v1138_v40  ;;  %v885_v47 = vadd.f32 %v1600_v45, %v2040_v2  ;;  %v1141_v48 = vadd.f32 %v1664_v46, %v2040_v2  ;;  %v876_v49 = vpop.f32.mrb[43].mxu0  ;;  %v1132_v50 = vpop.f32.mrb[43].mxu1 }
 0x131   :  { %1264 = vst [vmem:[%s2557_s3 + $0x140] sm:$0xff] %v874_v43  ;;  %1328 = vst [vmem:[%s2557_s3 + $0x340] sm:$0xff] %v1130_v44  ;;  %v877_v51 = vadd.f32 %v2040_v2, %v876_v49  ;;  %v1133_v52 = vadd.f32 %v2040_v2, %v1132_v50 }
 0x132   :  { %1267 = vst [vmem:[%s2557_s3 + $0x158] sm:$0xff] %v885_v47  ;;  %1331 = vst [vmem:[%s2557_s3 + $0x358] sm:$0xff] %v1141_v48 }
 0x133   :  { %1265 = vst [vmem:[%s2557_s3 + $0x148] sm:$0xff] %v877_v51  ;;  %1329 = vst [vmem:[%s2557_s3 + $0x348] sm:$0xff] %v1133_v52 }
 0x135   :  { %v1603_v53 = vpop.f32.mrb[44].mxu0  ;;  %v1667_v54 = vpop.f32.mrb[44].mxu1 }
 0x136   :  { %v898_v55 = vadd.f32 %v1603_v53, %v2040_v2  ;;  %v1154_v56 = vadd.f32 %v1667_v54, %v2040_v2  ;;  %v889_v57 = vpop.f32.mrb[45].mxu0  ;;  %v1145_v58 = vpop.f32.mrb[45].mxu1 }
 0x137   :  { %v890_v59 = vadd.f32 %v2040_v2, %v889_v57  ;;  %v1146_v60 = vadd.f32 %v2040_v2, %v1145_v58  ;;  %v1604_v61 = vpop.f32.mrb[46].mxu0  ;;  %v1668_v62 = vpop.f32.mrb[46].mxu1 }
 0x138   :  { %1270 = vst [vmem:[%s2557_s3 + $0x170] sm:$0xff] %v898_v55  ;;  %1334 = vst [vmem:[%s2557_s3 + $0x370] sm:$0xff] %v1154_v56  ;;  %v901_v63 = vadd.f32 %v1604_v61, %v2040_v2  ;;  %v1157_v0 = vadd.f32 %v1668_v62, %v2040_v2  ;;  %v892_v1 = vpop.f32.mrb[47].mxu0  ;;  %v1148_v3 = vpop.f32.mrb[47].mxu1 }
 0x139   :  { %1268 = vst [vmem:[%s2557_s3 + $0x160] sm:$0xff] %v890_v59  ;;  %1332 = vst [vmem:[%s2557_s3 + $0x360] sm:$0xff] %v1146_v60  ;;  %v893_v4 = vadd.f32 %v2040_v2, %v892_v1  ;;  %v1149_v5 = vadd.f32 %v2040_v2, %v1148_v3 }
 0x13a   :  { %1271 = vst [vmem:[%s2557_s3 + $0x178] sm:$0xff] %v901_v63  ;;  %1335 = vst [vmem:[%s2557_s3 + $0x378] sm:$0xff] %v1157_v0 }
 0x13b   :  { %1269 = vst [vmem:[%s2557_s3 + $0x168] sm:$0xff] %v893_v4  ;;  %1333 = vst [vmem:[%s2557_s3 + $0x368] sm:$0xff] %v1149_v5 }
 0x13d   :  { %v1607_v6 = vpop.f32.mrb[48].mxu0  ;;  %v1671_v7 = vpop.f32.mrb[48].mxu1 }
 0x13e   :  { %v914_v8 = vadd.f32 %v1607_v6, %v2040_v2  ;;  %v1170_v9 = vadd.f32 %v1671_v7, %v2040_v2  ;;  %v905_v10 = vpop.f32.mrb[49].mxu0  ;;  %v1161_v11 = vpop.f32.mrb[49].mxu1 }
 0x13f   :  { %v906_v12 = vadd.f32 %v2040_v2, %v905_v10  ;;  %v1162_v13 = vadd.f32 %v2040_v2, %v1161_v11  ;;  %v1608_v14 = vpop.f32.mrb[50].mxu0  ;;  %v1672_v15 = vpop.f32.mrb[50].mxu1 }
 0x140   :  { %1274 = vst [vmem:[%s2557_s3 + $0x190] sm:$0xff] %v914_v8  ;;  %1338 = vst [vmem:[%s2557_s3 + $0x390] sm:$0xff] %v1170_v9  ;;  %v917_v16 = vadd.f32 %v1608_v14, %v2040_v2  ;;  %v1173_v17 = vadd.f32 %v1672_v15, %v2040_v2  ;;  %v908_v18 = vpop.f32.mrb[51].mxu0  ;;  %v1164_v19 = vpop.f32.mrb[51].mxu1 }
 0x141   :  { %1272 = vst [vmem:[%s2557_s3 + $0x180] sm:$0xff] %v906_v12  ;;  %1336 = vst [vmem:[%s2557_s3 + $0x380] sm:$0xff] %v1162_v13  ;;  %v909_v20 = vadd.f32 %v2040_v2, %v908_v18  ;;  %v1165_v21 = vadd.f32 %v2040_v2, %v1164_v19 }
 0x142   :  { %1275 = vst [vmem:[%s2557_s3 + $0x198] sm:$0xff] %v917_v16  ;;  %1339 = vst [vmem:[%s2557_s3 + $0x398] sm:$0xff] %v1173_v17 }
 0x143   :  { %1273 = vst [vmem:[%s2557_s3 + $0x188] sm:$0xff] %v909_v20  ;;  %1337 = vst [vmem:[%s2557_s3 + $0x388] sm:$0xff] %v1165_v21 }
 0x145   :  { %v1611_v22 = vpop.f32.mrb[52].mxu0  ;;  %v1675_v23 = vpop.f32.mrb[52].mxu1 }
 0x146   :  { %v930_v24 = vadd.f32 %v1611_v22, %v2040_v2  ;;  %v1186_v25 = vadd.f32 %v1675_v23, %v2040_v2  ;;  %v921_v26 = vpop.f32.mrb[53].mxu0  ;;  %v1177_v27 = vpop.f32.mrb[53].mxu1 }
 0x147   :  { %v922_v28 = vadd.f32 %v2040_v2, %v921_v26  ;;  %v1178_v29 = vadd.f32 %v2040_v2, %v1177_v27  ;;  %v1612_v30 = vpop.f32.mrb[54].mxu0  ;;  %v1676_v31 = vpop.f32.mrb[54].mxu1 }
 0x148   :  { %1278 = vst [vmem:[%s2557_s3 + $0x1b0] sm:$0xff] %v930_v24  ;;  %1342 = vst [vmem:[%s2557_s3 + $0x3b0] sm:$0xff] %v1186_v25  ;;  %v933_v32 = vadd.f32 %v1612_v30, %v2040_v2  ;;  %v1189_v33 = vadd.f32 %v1676_v31, %v2040_v2  ;;  %v924_v34 = vpop.f32.mrb[55].mxu0  ;;  %v1180_v35 = vpop.f32.mrb[55].mxu1 }
 0x149   :  { %1276 = vst [vmem:[%s2557_s3 + $0x1a0] sm:$0xff] %v922_v28  ;;  %1340 = vst [vmem:[%s2557_s3 + $0x3a0] sm:$0xff] %v1178_v29  ;;  %v925_v36 = vadd.f32 %v2040_v2, %v924_v34  ;;  %v1181_v37 = vadd.f32 %v2040_v2, %v1180_v35 }
 0x14a   :  { %1279 = vst [vmem:[%s2557_s3 + $0x1b8] sm:$0xff] %v933_v32  ;;  %1343 = vst [vmem:[%s2557_s3 + $0x3b8] sm:$0xff] %v1189_v33 }
 0x14b   :  { %1277 = vst [vmem:[%s2557_s3 + $0x1a8] sm:$0xff] %v925_v36  ;;  %1341 = vst [vmem:[%s2557_s3 + $0x3a8] sm:$0xff] %v1181_v37 }
 0x14d   :  { %v1615_v38 = vpop.f32.mrb[56].mxu0  ;;  %v1679_v39 = vpop.f32.mrb[56].mxu1 }
 0x14e   :  { %v946_v40 = vadd.f32 %v1615_v38, %v2040_v2  ;;  %v1202_v41 = vadd.f32 %v1679_v39, %v2040_v2  ;;  %v937_v42 = vpop.f32.mrb[57].mxu0  ;;  %v1193_v43 = vpop.f32.mrb[57].mxu1 }
 0x14f   :  { %v938_v44 = vadd.f32 %v2040_v2, %v937_v42  ;;  %v1194_v45 = vadd.f32 %v2040_v2, %v1193_v43  ;;  %v1616_v46 = vpop.f32.mrb[58].mxu0  ;;  %v1680_v47 = vpop.f32.mrb[58].mxu1 }
 0x150   :  { %1282 = vst [vmem:[%s2557_s3 + $0x1d0] sm:$0xff] %v946_v40  ;;  %1346 = vst [vmem:[%s2557_s3 + $0x3d0] sm:$0xff] %v1202_v41  ;;  %v949_v48 = vadd.f32 %v1616_v46, %v2040_v2  ;;  %v1205_v49 = vadd.f32 %v1680_v47, %v2040_v2  ;;  %v940_v50 = vpop.f32.mrb[59].mxu0  ;;  %v1196_v51 = vpop.f32.mrb[59].mxu1 }
 0x151   :  { %1280 = vst [vmem:[%s2557_s3 + $0x1c0] sm:$0xff] %v938_v44  ;;  %1344 = vst [vmem:[%s2557_s3 + $0x3c0] sm:$0xff] %v1194_v45  ;;  %v941_v52 = vadd.f32 %v2040_v2, %v940_v50  ;;  %v1197_v53 = vadd.f32 %v2040_v2, %v1196_v51 }
 0x152   :  { %1283 = vst [vmem:[%s2557_s3 + $0x1d8] sm:$0xff] %v949_v48  ;;  %1347 = vst [vmem:[%s2557_s3 + $0x3d8] sm:$0xff] %v1205_v49 }
 0x153   :  { %1281 = vst [vmem:[%s2557_s3 + $0x1c8] sm:$0xff] %v941_v52  ;;  %1345 = vst [vmem:[%s2557_s3 + $0x3c8] sm:$0xff] %v1197_v53 }
 0x155   :  { %v1619_v54 = vpop.f32.mrb[60].mxu0  ;;  %v1683_v55 = vpop.f32.mrb[60].mxu1 }
 0x156   :  { %v962_v56 = vadd.f32 %v1619_v54, %v2040_v2  ;;  %v1218_v57 = vadd.f32 %v1683_v55, %v2040_v2  ;;  %v953_v58 = vpop.f32.mrb[61].mxu0  ;;  %v1209_v59 = vpop.f32.mrb[61].mxu1 }
 0x157   :  { %v954_v60 = vadd.f32 %v2040_v2, %v953_v58  ;;  %v1210_v61 = vadd.f32 %v2040_v2, %v1209_v59  ;;  %v1620_v62 = vpop.f32.mrb[62].mxu0  ;;  %v1684_v63 = vpop.f32.mrb[62].mxu1 }
 0x158   :  { %1286 = vst [vmem:[%s2557_s3 + $0x1f0] sm:$0xff] %v962_v56  ;;  %1350 = vst [vmem:[%s2557_s3 + $0x3f0] sm:$0xff] %v1218_v57  ;;  %v965_v0 = vadd.f32 %v1620_v62, %v2040_v2  ;;  %v1221_v1 = vadd.f32 %v1684_v63, %v2040_v2  ;;  %v956_v3 = vpop.f32.mrb[63].mxu0  ;;  %v1212_v4 = vpop.f32.mrb[63].mxu1 }
 0x159   :  { %1284 = vst [vmem:[%s2557_s3 + $0x1e0] sm:$0xff] %v954_v60  ;;  %1348 = vst [vmem:[%s2557_s3 + $0x3e0] sm:$0xff] %v1210_v61  ;;  %v957_v5 = vadd.f32 %v2040_v2, %v956_v3  ;;  %v1213_v6 = vadd.f32 %v2040_v2, %v1212_v4 }
 0x15a   :  { %1287 = vst [vmem:[%s2557_s3 + $0x1f8] sm:$0xff] %v965_v0  ;;  %1351 = vst [vmem:[%s2557_s3 + $0x3f8] sm:$0xff] %v1221_v1 }
 0x15b   :  { %1285 = vst [vmem:[%s2557_s3 + $0x1e8] sm:$0xff] %v957_v5  ;;  %1349 = vst [vmem:[%s2557_s3 + $0x3e8] sm:$0xff] %v1213_v6 }

// kernel: rp_context_prior_forward.3
= control target key start
LH: loop header
LB: loop body
LE: loop exit
PB: predicated region body
PF: predicated region fallthrough
CT: control target
= control target key end

     0   :  { %vm1720_vm0 = vcmask 261120   ;;  %vm650_vm1 = vcmask 785408   ;;  %s4549_s0 = inlined_call_operand.vmem [shape: bf16[1024,32], index: 0, kind: input, shape index: {}]   ;;  %s4550_s1 = inlined_call_operand.vmem [shape: bf16[1024,96], index: 1, kind: input, shape index: {}]   ;;  %s4551_s2 = inlined_call_operand.vmem [shape: bf16[32,32], index: 2, kind: input, shape index: {}]   ;;  %s4552_s3 = inlined_call_operand.vmem [shape: bf16[96,32], index: 3, kind: input, shape index: {}]   ;;  %s4553_s4 = inlined_call_operand.vmem [shape: f32[1,32], index: 4, kind: input, shape index: {}]   ;;  %s4554_s5 = inlined_call_operand.hbm [shape: f32[1024,32], index: 5, kind: output, shape index: {}]  }
   0x1   :  { %v3541_v0 = vld [vmem:[%s4552_s3] sm:$0xff]   ;;  %v3542_v1 = vld [vmem:[%s4552_s3 + $0x8] sm:$0xff]   ;;  %v3543_v2 = vld [vmem:[%s4552_s3 + $0x10] sm:$0xff]  }
   0x2   :  { %3138 = vmatprep.subr.bf16.mxu1 %v3541_v0  ;;  %v3545_v3 = vld [vmem:[%s4551_s2] sm:$0xff]   ;;  %v3547_v4 = vld [vmem:[%s4551_s2 + $0x8] sm:$0xff]   ;;  %v3544_v5 = vld [vmem:[%s4552_s3 + $0x18] sm:$0xff]  }
   0x3   :  { %3139 = vmatpush3.bf16.msra.mxu1 %v3541_v0  ;;  %3278 = vmatprep.subr.bf16.mxu0 %v3545_v3  ;;  %v3549_v6 = vld [vmem:[%s4549_s0] sm:$0xff]   ;;  %v3550_v7 = vld [vmem:[%s4549_s0 + $0x8] sm:$0xff]   ;;  %v3553_v10 = vld [vmem:[%s4549_s0 + $0x10] sm:$0xff]  }
   0x4   :  { %3140 = vmatprep.subr.bf16.mxu1 %v3542_v1  ;;  %3279 = vmatpush3.bf16.msra.mxu0 %v3545_v3  ;;  %v3551_v8 = vld [vmem:[%s4550_s1] sm:$0xff]   ;;  %v3548_v11 = vld [vmem:[%s4552_s3 + $0x28] sm:$0xff]   ;;  %v3554_v12 = vld [vmem:[%s4549_s0 + $0x18] sm:$0xff]  }
   0x5   :  { %3280 = vmatprep.subr.bf16.mxu0 %v3547_v4  ;;  %3282 = vmatprep.mubr.msk.bf16.mxu0 %vm1720_vm0, %v3549_v6  ;;  %v3546_v9 = vld [vmem:[%s4552_s3 + $0x20] sm:$0xff]   ;;  %v3552_v14 = vld [vmem:[%s4550_s1 + $0x8] sm:$0xff]   ;;  %v3555_v15 = vld [vmem:[%s4550_s1 + $0x10] sm:$0xff]  }
   0x6   :  { %3150 = vmatprep.mubr.msk.bf16.mxu1 %vm650_vm1, %v3551_v8  ;;  %v3557_v13 = vld [vmem:[%s4549_s0 + $0x20] sm:$0xff]   ;;  %v3558_v16 = vld [vmem:[%s4549_s0 + $0x28] sm:$0xff]   ;;  %v3561_v17 = vld [vmem:[%s4549_s0 + $0x30] sm:$0xff]  }
   0x7   :  { %3141 = vmatpush3.bf16.msra.mxu1 %v3542_v1  ;;  %v3556_v18 = vld [vmem:[%s4550_s1 + $0x18] sm:$0xff]   ;;  %v3559_v19 = vld [vmem:[%s4550_s1 + $0x20] sm:$0xff]   ;;  %v3560_v22 = vld [vmem:[%s4550_s1 + $0x28] sm:$0xff]  }
   0x8   :  { %3142 = vmatprep.subr.bf16.mxu1 %v3543_v2  ;;  %3281 = vmatpush3.bf16.msra.mxu0 %v3547_v4  ;;  %v3562_v20 = vld [vmem:[%s4549_s0 + $0x38] sm:$0xff]   ;;  %v3565_v21 = vld [vmem:[%s4549_s0 + $0x40] sm:$0xff]   ;;  %v3563_v23 = vld [vmem:[%s4550_s1 + $0x30] sm:$0xff]  }
   0x9   :  { %v3566_v24 = vld [vmem:[%s4549_s0 + $0x48] sm:$0xff]   ;;  %v3569_v25 = vld [vmem:[%s4549_s0 + $0x50] sm:$0xff]   ;;  %v3564_v26 = vld [vmem:[%s4550_s1 + $0x38] sm:$0xff]  }
   0xa   :  { %v3567_v27 = vld [vmem:[%s4550_s1 + $0x40] sm:$0xff]   ;;  %v3570_v28 = vld [vmem:[%s4549_s0 + $0x58] sm:$0xff]   ;;  %v3568_v30 = vld [vmem:[%s4550_s1 + $0x48] sm:$0xff]  }
   0xb   :  { %3143 = vmatpush3.bf16.msra.mxu1 %v3543_v2  ;;  %3283 = vmatmul.mubr.msk.bf16.vlgmr.msra.gmra.mrb[0].mxu0 %vm1720_vm0, %v3550_v7  ;;  %v3573_v29 = vld [vmem:[%s4549_s0 + $0x60] sm:$0xff]   ;;  %v3571_v31 = vld [vmem:[%s4550_s1 + $0x50] sm:$0xff]   ;;  %v3574_v32 = vld [vmem:[%s4549_s0 + $0x68] sm:$0xff]  }
   0xc   :  { %3144 = vmatprep.subr.bf16.mxu1 %v3544_v5  ;;  %3286 = vmatprep.mubr.msk.bf16.mxu0 %vm1720_vm0, %v3553_v10  ;;  %v3577_v33 = vld [vmem:[%s4549_s0 + $0x70] sm:$0xff]   ;;  %v3572_v34 = vld [vmem:[%s4550_s1 + $0x58] sm:$0xff]   ;;  %v3575_v35 = vld [vmem:[%s4550_s1 + $0x60] sm:$0xff]  }
   0xd   :  { %v3578_v36 = vld [vmem:[%s4549_s0 + $0x78] sm:$0xff]   ;;  %v3581_v37 = vld [vmem:[%s4549_s0 + $0x80] sm:$0xff]   ;;  %v3576_v38 = vld [vmem:[%s4550_s1 + $0x68] sm:$0xff]  }
   0xe   :  { %v3579_v39 = vld [vmem:[%s4550_s1 + $0x70] sm:$0xff]   ;;  %v3582_v40 = vld [vmem:[%s4549_s0 + $0x88] sm:$0xff]   ;;  %v3580_v42 = vld [vmem:[%s4550_s1 + $0x78] sm:$0xff]  }
   0xf   :  { %3145 = vmatpush3.bf16.msra.mxu1 %v3544_v5  ;;  %v3585_v41 = vld [vmem:[%s4549_s0 + $0x90] sm:$0xff]   ;;  %v3583_v43 = vld [vmem:[%s4550_s1 + $0x80] sm:$0xff]   ;;  %v3586_v44 = vld [vmem:[%s4549_s0 + $0x98] sm:$0xff]  }
  0x10   :  { %3146 = vmatprep.subr.bf16.mxu1 %v3546_v9  ;;  %v3589_v45 = vld [vmem:[%s4549_s0 + $0xa0] sm:$0xff]   ;;  %v3584_v46 = vld [vmem:[%s4550_s1 + $0x88] sm:$0xff]   ;;  %v3587_v47 = vld [vmem:[%s4550_s1 + $0x90] sm:$0xff]  }
  0x11   :  { %v3590_v48 = vld [vmem:[%s4549_s0 + $0xa8] sm:$0xff]   ;;  %v3593_v49 = vld [vmem:[%s4549_s0 + $0xb0] sm:$0xff]   ;;  %v3588_v50 = vld [vmem:[%s4550_s1 + $0x98] sm:$0xff]  }
  0x12   :  { %v3591_v51 = vld [vmem:[%s4550_s1 + $0xa0] sm:$0xff]   ;;  %v3594_v52 = vld [vmem:[%s4549_s0 + $0xb8] sm:$0xff]   ;;  %v3592_v54 = vld [vmem:[%s4550_s1 + $0xa8] sm:$0xff]  }
  0x13   :  { %3147 = vmatpush3.bf16.msra.mxu1 %v3546_v9  ;;  %3287 = vmatmul.mubr.msk.bf16.gmra.mrb[4].mxu0 %vm1720_vm0, %v3554_v12  ;;  %v3597_v53 = vld [vmem:[%s4549_s0 + $0xc0] sm:$0xff]   ;;  %v3595_v55 = vld [vmem:[%s4550_s1 + $0xb0] sm:$0xff]   ;;  %v3598_v56 = vld [vmem:[%s4549_s0 + $0xc8] sm:$0xff]  }
  0x14   :  { %3148 = vmatprep.subr.bf16.mxu1 %v3548_v11  ;;  %3290 = vmatprep.mubr.msk.bf16.mxu0 %vm1720_vm0, %v3557_v13  ;;  %v3601_v57 = vld [vmem:[%s4549_s0 + $0xd0] sm:$0xff]   ;;  %v3596_v58 = vld [vmem:[%s4550_s1 + $0xb8] sm:$0xff]   ;;  %v3599_v59 = vld [vmem:[%s4550_s1 + $0xc0] sm:$0xff]  }
  0x15   :  { %v3602_v60 = vld [vmem:[%s4549_s0 + $0xd8] sm:$0xff]   ;;  %v3605_v61 = vld [vmem:[%s4549_s0 + $0xe0] sm:$0xff]   ;;  %v3600_v62 = vld [vmem:[%s4550_s1 + $0xc8] sm:$0xff]  }
  0x16   :  { %v3603_v63 = vld [vmem:[%s4550_s1 + $0xd0] sm:$0xff]   ;;  %v3606_v0 = vld [vmem:[%s4549_s0 + $0xe8] sm:$0xff]   ;;  %v3604_v2 = vld [vmem:[%s4550_s1 + $0xd8] sm:$0xff]  }
  0x17   :  { %3149 = vmatpush3.bf16.msra.mxu1 %v3548_v11  ;;  %v3609_v1 = vld [vmem:[%s4549_s0 + $0xf0] sm:$0xff]   ;;  %v3607_v3 = vld [vmem:[%s4550_s1 + $0xe0] sm:$0xff]   ;;  %v3610_v4 = vld [vmem:[%s4549_s0 + $0xf8] sm:$0xff]  }
  0x18   :  { %v3613_v5 = vld [vmem:[%s4549_s0 + $0x100] sm:$0xff]   ;;  %v3608_v6 = vld [vmem:[%s4550_s1 + $0xe8] sm:$0xff]  }
  0x1a   :  { %3151 = vmatmul.mubr.msk.bf16.vlgmr.msra.gmra.mrb[0].mxu1 %vm650_vm1, %v3552_v14 }
  0x1b   :  { %3154 = vmatprep.mubr.msk.bf16.mxu1 %vm650_vm1, %v3555_v15  ;;  %3291 = vmatmul.mubr.msk.bf16.gmra.mrb[8].mxu0 %vm1720_vm0, %v3558_v16 }
  0x1c   :  { %3294 = vmatprep.mubr.msk.bf16.mxu0 %vm1720_vm0, %v3561_v17 }
  0x22   :  { %3155 = vmatmul.mubr.msk.bf16.gmra.mrb[4].mxu1 %vm650_vm1, %v3556_v18 }
  0x23   :  { %3158 = vmatprep.mubr.msk.bf16.mxu1 %vm650_vm1, %v3559_v19  ;;  %3295 = vmatmul.mubr.msk.bf16.gmra.mrb[12].mxu0 %vm1720_vm0, %v3562_v20 }
  0x24   :  { %3298 = vmatprep.mubr.msk.bf16.mxu0 %vm1720_vm0, %v3565_v21 }
  0x2a   :  { %3159 = vmatmul.mubr.msk.bf16.gmra.mrb[8].mxu1 %vm650_vm1, %v3560_v22 }
  0x2b   :  { %3162 = vmatprep.mubr.msk.bf16.mxu1 %vm650_vm1, %v3563_v23  ;;  %3299 = vmatmul.mubr.msk.bf16.gmra.mrb[16].mxu0 %vm1720_vm0, %v3566_v24 }
  0x2c   :  { %3302 = vmatprep.mubr.msk.bf16.mxu0 %vm1720_vm0, %v3569_v25 }
  0x32   :  { %3163 = vmatmul.mubr.msk.bf16.gmra.mrb[12].mxu1 %vm650_vm1, %v3564_v26 }
  0x33   :  { %3166 = vmatprep.mubr.msk.bf16.mxu1 %vm650_vm1, %v3567_v27  ;;  %3303 = vmatmul.mubr.msk.bf16.gmra.mrb[20].mxu0 %vm1720_vm0, %v3570_v28 }
  0x34   :  { %3306 = vmatprep.mubr.msk.bf16.mxu0 %vm1720_vm0, %v3573_v29 }
  0x3a   :  { %3167 = vmatmul.mubr.msk.bf16.gmra.mrb[16].mxu1 %vm650_vm1, %v3568_v30 }
  0x3b   :  { %3170 = vmatprep.mubr.msk.bf16.mxu1 %vm650_vm1, %v3571_v31  ;;  %3307 = vmatmul.mubr.msk.bf16.gmra.mrb[24].mxu0 %vm1720_vm0, %v3574_v32 }
  0x3c   :  { %3310 = vmatprep.mubr.msk.bf16.mxu0 %vm1720_vm0, %v3577_v33 }
  0x42   :  { %3171 = vmatmul.mubr.msk.bf16.gmra.mrb[20].mxu1 %vm650_vm1, %v3572_v34 }
  0x43   :  { %3174 = vmatprep.mubr.msk.bf16.mxu1 %vm650_vm1, %v3575_v35  ;;  %3311 = vmatmul.mubr.msk.bf16.gmra.mrb[28].mxu0 %vm1720_vm0, %v3578_v36 }
  0x44   :  { %3314 = vmatprep.mubr.msk.bf16.mxu0 %vm1720_vm0, %v3581_v37 }
  0x4a   :  { %3175 = vmatmul.mubr.msk.bf16.gmra.mrb[24].mxu1 %vm650_vm1, %v3576_v38 }
  0x4b   :  { %3178 = vmatprep.mubr.msk.bf16.mxu1 %vm650_vm1, %v3579_v39  ;;  %3315 = vmatmul.mubr.msk.bf16.gmra.mrb[32].mxu0 %vm1720_vm0, %v3582_v40 }
  0x4c   :  { %3318 = vmatprep.mubr.msk.bf16.mxu0 %vm1720_vm0, %v3585_v41 }
  0x52   :  { %3179 = vmatmul.mubr.msk.bf16.gmra.mrb[28].mxu1 %vm650_vm1, %v3580_v42 }
  0x53   :  { %3182 = vmatprep.mubr.msk.bf16.mxu1 %vm650_vm1, %v3583_v43  ;;  %3319 = vmatmul.mubr.msk.bf16.gmra.mrb[36].mxu0 %vm1720_vm0, %v3586_v44 }
  0x54   :  { %3322 = vmatprep.mubr.msk.bf16.mxu0 %vm1720_vm0, %v3589_v45 }
  0x5a   :  { %3183 = vmatmul.mubr.msk.bf16.gmra.mrb[32].mxu1 %vm650_vm1, %v3584_v46 }
  0x5b   :  { %3186 = vmatprep.mubr.msk.bf16.mxu1 %vm650_vm1, %v3587_v47  ;;  %3323 = vmatmul.mubr.msk.bf16.gmra.mrb[40].mxu0 %vm1720_vm0, %v3590_v48 }
  0x5c   :  { %3326 = vmatprep.mubr.msk.bf16.mxu0 %vm1720_vm0, %v3593_v49 }
  0x62   :  { %3187 = vmatmul.mubr.msk.bf16.gmra.mrb[36].mxu1 %vm650_vm1, %v3588_v50 }
  0x63   :  { %3190 = vmatprep.mubr.msk.bf16.mxu1 %vm650_vm1, %v3591_v51  ;;  %3327 = vmatmul.mubr.msk.bf16.gmra.mrb[44].mxu0 %vm1720_vm0, %v3594_v52 }
  0x64   :  { %3330 = vmatprep.mubr.msk.bf16.mxu0 %vm1720_vm0, %v3597_v53 }
  0x6a   :  { %3191 = vmatmul.mubr.msk.bf16.gmra.mrb[40].mxu1 %vm650_vm1, %v3592_v54 }
  0x6b   :  { %3194 = vmatprep.mubr.msk.bf16.mxu1 %vm650_vm1, %v3595_v55  ;;  %3331 = vmatmul.mubr.msk.bf16.gmra.mrb[48].mxu0 %vm1720_vm0, %v3598_v56 }
  0x6c   :  { %3334 = vmatprep.mubr.msk.bf16.mxu0 %vm1720_vm0, %v3601_v57 }
  0x72   :  { %3195 = vmatmul.mubr.msk.bf16.gmra.mrb[44].mxu1 %vm650_vm1, %v3596_v58 }
  0x73   :  { %3198 = vmatprep.mubr.msk.bf16.mxu1 %vm650_vm1, %v3599_v59  ;;  %3335 = vmatmul.mubr.msk.bf16.gmra.mrb[52].mxu0 %vm1720_vm0, %v3602_v60 }
  0x74   :  { %3338 = vmatprep.mubr.msk.bf16.mxu0 %vm1720_vm0, %v3605_v61 }
  0x7a   :  { %3199 = vmatmul.mubr.msk.bf16.gmra.mrb[48].mxu1 %vm650_vm1, %v3600_v62 }
  0x7b   :  { %3202 = vmatprep.mubr.msk.bf16.mxu1 %vm650_vm1, %v3603_v63  ;;  %3339 = vmatmul.mubr.msk.bf16.gmra.mrb[56].mxu0 %vm1720_vm0, %v3606_v0 }
  0x7c   :  { %3342 = vmatprep.mubr.msk.bf16.mxu0 %vm1720_vm0, %v3609_v1 }
  0x82   :  { %3203 = vmatmul.mubr.msk.bf16.gmra.mrb[52].mxu1 %vm650_vm1, %v3604_v2 }
  0x83   :  { %3206 = vmatprep.mubr.msk.bf16.mxu1 %vm650_vm1, %v3607_v3  ;;  %3343 = vmatmul.mubr.msk.bf16.gmra.mrb[60].mxu0 %vm1720_vm0, %v3610_v4 }
  0x84   :  { %10 = vsyncpa [#allocation3], 0  ;;  %v3611_v7 = vld [vmem:[%s4550_s1 + $0xf0] sm:$0xff]   ;;  %3346 = vmatprep.mubr.msk.bf16.mxu0 %vm1720_vm0, %v3613_v5  ;;  %v3614_v8 = vld [vmem:[%s4549_s0 + $0x108] sm:$0xff]  }
  0x85   :  { %v3617_v9 = vld [vmem:[%s4549_s0 + $0x110] sm:$0xff]   ;;  %v3612_v10 = vld [vmem:[%s4550_s1 + $0xf8] sm:$0xff]   ;;  %v3615_v11 = vld [vmem:[%s4550_s1 + $0x100] sm:$0xff]  }
  0x86   :  { %v3618_v12 = vld [vmem:[%s4549_s0 + $0x118] sm:$0xff]   ;;  %v3621_v13 = vld [vmem:[%s4549_s0 + $0x120] sm:$0xff]   ;;  %v3616_v14 = vld [vmem:[%s4550_s1 + $0x108] sm:$0xff]  }
  0x87   :  { %v3619_v15 = vld [vmem:[%s4550_s1 + $0x110] sm:$0xff]   ;;  %v3622_v16 = vld [vmem:[%s4549_s0 + $0x128] sm:$0xff]   ;;  %v3620_v18 = vld [vmem:[%s4550_s1 + $0x118] sm:$0xff]  }
  0x88   :  { %v3625_v17 = vld [vmem:[%s4549_s0 + $0x130] sm:$0xff]   ;;  %v3623_v19 = vld [vmem:[%s4550_s1 + $0x120] sm:$0xff]   ;;  %v3626_v20 = vld [vmem:[%s4549_s0 + $0x138] sm:$0xff]  }
  0x89   :  { %v3629_v21 = vld [vmem:[%s4549_s0 + $0x140] sm:$0xff]   ;;  %v3624_v22 = vld [vmem:[%s4550_s1 + $0x128] sm:$0xff]   ;;  %v3627_v23 = vld [vmem:[%s4550_s1 + $0x130] sm:$0xff]  }
  0x8a   :  { %3207 = vmatmul.mubr.msk.bf16.gmra.mrb[56].mxu1 %vm650_vm1, %v3608_v6  ;;  %v3630_v24 = vld [vmem:[%s4549_s0 + $0x148] sm:$0xff]   ;;  %v3633_v25 = vld [vmem:[%s4549_s0 + $0x150] sm:$0xff]   ;;  %v3628_v26 = vld [vmem:[%s4550_s1 + $0x138] sm:$0xff]  }
  0x8b   :  { %3210 = vmatprep.mubr.msk.bf16.mxu1 %vm650_vm1, %v3611_v7  ;;  %3347 = vmatmul.mubr.msk.bf16.gmra.mrb[64].mxu0 %vm1720_vm0, %v3614_v8  ;;  %v3631_v27 = vld [vmem:[%s4550_s1 + $0x140] sm:$0xff]   ;;  %v3634_v28 = vld [vmem:[%s4549_s0 + $0x158] sm:$0xff]   ;;  %v3632_v30 = vld [vmem:[%s4550_s1 + $0x148] sm:$0xff]  }
  0x8c   :  { %3350 = vmatprep.mubr.msk.bf16.mxu0 %vm1720_vm0, %v3617_v9  ;;  %v3637_v29 = vld [vmem:[%s4549_s0 + $0x160] sm:$0xff]   ;;  %v3635_v31 = vld [vmem:[%s4550_s1 + $0x150] sm:$0xff]   ;;  %v3638_v32 = vld [vmem:[%s4549_s0 + $0x168] sm:$0xff]  }
  0x8d   :  { %v3641_v33 = vld [vmem:[%s4549_s0 + $0x170] sm:$0xff]   ;;  %v3636_v34 = vld [vmem:[%s4550_s1 + $0x158] sm:$0xff]   ;;  %v3639_v35 = vld [vmem:[%s4550_s1 + $0x160] sm:$0xff]  }
  0x8e   :  { %v3642_v36 = vld [vmem:[%s4549_s0 + $0x178] sm:$0xff]   ;;  %v3645_v37 = vld [vmem:[%s4549_s0 + $0x180] sm:$0xff]   ;;  %v3640_v38 = vld [vmem:[%s4550_s1 + $0x168] sm:$0xff]  }
  0x8f   :  { %v3643_v39 = vld [vmem:[%s4550_s1 + $0x170] sm:$0xff]   ;;  %v3646_v40 = vld [vmem:[%s4549_s0 + $0x188] sm:$0xff]   ;;  %v3644_v42 = vld [vmem:[%s4550_s1 + $0x178] sm:$0xff]  }
  0x90   :  { %v3649_v41 = vld [vmem:[%s4549_s0 + $0x190] sm:$0xff]   ;;  %v3647_v43 = vld [vmem:[%s4550_s1 + $0x180] sm:$0xff]   ;;  %v3650_v44 = vld [vmem:[%s4549_s0 + $0x198] sm:$0xff]  }
  0x91   :  { %v3653_v45 = vld [vmem:[%s4549_s0 + $0x1a0] sm:$0xff]   ;;  %v3648_v46 = vld [vmem:[%s4550_s1 + $0x188] sm:$0xff]   ;;  %v3651_v47 = vld [vmem:[%s4550_s1 + $0x190] sm:$0xff]  }
  0x92   :  { %3211 = vmatmul.mubr.msk.bf16.gmra.mrb[60].mxu1 %vm650_vm1, %v3612_v10  ;;  %v3654_v48 = vld [vmem:[%s4549_s0 + $0x1a8] sm:$0xff]   ;;  %v3657_v49 = vld [vmem:[%s4549_s0 + $0x1b0] sm:$0xff]   ;;  %v3652_v50 = vld [vmem:[%s4550_s1 + $0x198] sm:$0xff]  }
  0x93   :  { %3214 = vmatprep.mubr.msk.bf16.mxu1 %vm650_vm1, %v3615_v11  ;;  %3351 = vmatmul.mubr.msk.bf16.gmra.mrb[68].mxu0 %vm1720_vm0, %v3618_v12  ;;  %v3655_v51 = vld [vmem:[%s4550_s1 + $0x1a0] sm:$0xff]   ;;  %v3658_v54 = vld [vmem:[%s4549_s0 + $0x1b8] sm:$0xff]   ;;  %v3656_v58 = vld [vmem:[%s4550_s1 + $0x1a8] sm:$0xff]  }
  0x94   :  { %3354 = vmatprep.mubr.msk.bf16.mxu0 %vm1720_vm0, %v3621_v13  ;;  %v3661_v56 = vld [vmem:[%s4549_s0 + $0x1c0] sm:$0xff]   ;;  %v3659_v59 = vld [vmem:[%s4550_s1 + $0x1b0] sm:$0xff]   ;;  %v3662_v62 = vld [vmem:[%s4549_s0 + $0x1c8] sm:$0xff]  }
  0x95   :  { %v3665_v0 = vld [vmem:[%s4549_s0 + $0x1d0] sm:$0xff]   ;;  %v4216_v3 = vld [vmem:[%s4553_s4] ss:$0 sm:$0xff]  ;;  %v3660_v6 = vld [vmem:[%s4550_s1 + $0x1b8] sm:$0xff]  }
  0x96   :  { %v3663_v9 = vld [vmem:[%s4550_s1 + $0x1c0] sm:$0xff]  }
  0x9a   :  { %3215 = vmatmul.mubr.msk.bf16.gmra.mrb[64].mxu1 %vm650_vm1, %v3616_v14 }
  0x9b   :  { %3218 = vmatprep.mubr.msk.bf16.mxu1 %vm650_vm1, %v3619_v15  ;;  %3355 = vmatmul.mubr.msk.bf16.gmra.mrb[72].mxu0 %vm1720_vm0, %v3622_v16 }
  0x9c   :  { %3358 = vmatprep.mubr.msk.bf16.mxu0 %vm1720_vm0, %v3625_v17 }
  0xa2   :  { %3219 = vmatmul.mubr.msk.bf16.gmra.mrb[68].mxu1 %vm650_vm1, %v3620_v18  ;;  %v3666_v18 = vld [vmem:[%s4549_s0 + $0x1d8] sm:$0xff]  }
  0xa3   :  { %3222 = vmatprep.mubr.msk.bf16.mxu1 %vm650_vm1, %v3623_v19  ;;  %3359 = vmatmul.mubr.msk.bf16.gmra.mrb[76].mxu0 %vm1720_vm0, %v3626_v20 }
  0xa4   :  { %3362 = vmatprep.mubr.msk.bf16.mxu0 %vm1720_vm0, %v3629_v21  ;;  %v3669_v21 = vld [vmem:[%s4549_s0 + $0x1e0] sm:$0xff]  }
  0xaa   :  { %3223 = vmatmul.mubr.msk.bf16.gmra.mrb[72].mxu1 %vm650_vm1, %v3624_v22 }
  0xab   :  { %3226 = vmatprep.mubr.msk.bf16.mxu1 %vm650_vm1, %v3627_v23  ;;  %3363 = vmatmul.mubr.msk.bf16.gmra.mrb[80].mxu0 %vm1720_vm0, %v3630_v24 }
  0xac   :  { %3366 = vmatprep.mubr.msk.bf16.mxu0 %vm1720_vm0, %v3633_v25 }
  0xb2   :  { %3227 = vmatmul.mubr.msk.bf16.gmra.mrb[76].mxu1 %vm650_vm1, %v3628_v26  ;;  %v3664_v26 = vld [vmem:[%s4550_s1 + $0x1c8] sm:$0xff]  }
  0xb3   :  { %3230 = vmatprep.mubr.msk.bf16.mxu1 %vm650_vm1, %v3631_v27  ;;  %3367 = vmatmul.mubr.msk.bf16.gmra.mrb[84].mxu0 %vm1720_vm0, %v3634_v28 }
  0xb4   :  { %3370 = vmatprep.mubr.msk.bf16.mxu0 %vm1720_vm0, %v3637_v29  ;;  %v3667_v29 = vld [vmem:[%s4550_s1 + $0x1d0] sm:$0xff]  }
  0xba   :  { %3231 = vmatmul.mubr.msk.bf16.gmra.mrb[80].mxu1 %vm650_vm1, %v3632_v30 }
  0xbb   :  { %3234 = vmatprep.mubr.msk.bf16.mxu1 %vm650_vm1, %v3635_v31  ;;  %3371 = vmatmul.mubr.msk.bf16.gmra.mrb[88].mxu0 %vm1720_vm0, %v3638_v32 }
  0xbc   :  { %3374 = vmatprep.mubr.msk.bf16.mxu0 %vm1720_vm0, %v3641_v33 }
  0xc2   :  { %3235 = vmatmul.mubr.msk.bf16.gmra.mrb[84].mxu1 %vm650_vm1, %v3636_v34 }
  0xc3   :  { %3238 = vmatprep.mubr.msk.bf16.mxu1 %vm650_vm1, %v3639_v35  ;;  %3375 = vmatmul.mubr.msk.bf16.gmra.mrb[92].mxu0 %vm1720_vm0, %v3642_v36 }
  0xc4   :  { %3378 = vmatprep.mubr.msk.bf16.mxu0 %vm1720_vm0, %v3645_v37 }
  0xca   :  { %3239 = vmatmul.mubr.msk.bf16.gmra.mrb[88].mxu1 %vm650_vm1, %v3640_v38  ;;  %v3670_v38 = vld [vmem:[%s4549_s0 + $0x1e8] sm:$0xff]  }
  0xcb   :  { %3242 = vmatprep.mubr.msk.bf16.mxu1 %vm650_vm1, %v3643_v39  ;;  %3379 = vmatmul.mubr.msk.bf16.gmra.mrb[96].mxu0 %vm1720_vm0, %v3646_v40 }
  0xcc   :  { %3382 = vmatprep.mubr.msk.bf16.mxu0 %vm1720_vm0, %v3649_v41  ;;  %v3673_v41 = vld [vmem:[%s4549_s0 + $0x1f0] sm:$0xff]  }
  0xd2   :  { %3243 = vmatmul.mubr.msk.bf16.gmra.mrb[92].mxu1 %vm650_vm1, %v3644_v42 }
  0xd3   :  { %3246 = vmatprep.mubr.msk.bf16.mxu1 %vm650_vm1, %v3647_v43  ;;  %3383 = vmatmul.mubr.msk.bf16.gmra.mrb[100].mxu0 %vm1720_vm0, %v3650_v44 }
  0xd4   :  { %3386 = vmatprep.mubr.msk.bf16.mxu0 %vm1720_vm0, %v3653_v45 }
  0xda   :  { %3247 = vmatmul.mubr.msk.bf16.gmra.mrb[96].mxu1 %vm650_vm1, %v3648_v46  ;;  %v3668_v46 = vld [vmem:[%s4550_s1 + $0x1d8] sm:$0xff]  }
  0xdb   :  { %3250 = vmatprep.mubr.msk.bf16.mxu1 %vm650_vm1, %v3651_v47  ;;  %3387 = vmatmul.mubr.msk.bf16.gmra.mrb[104].mxu0 %vm1720_vm0, %v3654_v48 }
  0xdc   :  { %3390 = vmatprep.mubr.msk.bf16.mxu0 %vm1720_vm0, %v3657_v49  ;;  %v3671_v49 = vld [vmem:[%s4550_s1 + $0x1e0] sm:$0xff]  }
  0xde   :  { %v3284_v52 = vpop.f32.mrb[0].mxu0 }
  0xdf   :  { %v1947_v53 = vpop.f32.mrb[1].mxu0 }
  0xe0   :  { %v3285_v55 = vpop.f32.mrb[2].mxu0 }
  0xe1   :  { %v1950_v57 = vpop.f32.mrb[3].mxu0 }
  0xe2   :  { %3251 = vmatmul.mubr.msk.bf16.gmra.mrb[100].mxu1 %vm650_vm1, %v3652_v50 }
  0xe3   :  { %3254 = vmatprep.mubr.msk.bf16.mxu1 %vm650_vm1, %v3655_v51  ;;  %3391 = vmatmul.mubr.msk.bf16.gmra.mrb[108].mxu0 %vm1720_vm0, %v3658_v54 }
  0xe4   :  { %3394 = vmatprep.mubr.msk.bf16.mxu0 %vm1720_vm0, %v3661_v56 }
  0xe6   :  { %v3288_v60 = vpop.f32.mrb[4].mxu0 }
  0xe7   :  { %v1963_v61 = vpop.f32.mrb[5].mxu0 }
  0xe8   :  { %v3289_v63 = vpop.f32.mrb[6].mxu0 }
  0xe9   :  { %v1966_v1 = vpop.f32.mrb[7].mxu0 }
  0xea   :  { %3255 = vmatmul.mubr.msk.bf16.gmra.mrb[104].mxu1 %vm650_vm1, %v3656_v58  ;;  %v3674_v58 = vld [vmem:[%s4549_s0 + $0x1f8] sm:$0xff]  }
  0xeb   :  { %3258 = vmatprep.mubr.msk.bf16.mxu1 %vm650_vm1, %v3659_v59  ;;  %3395 = vmatmul.mubr.msk.bf16.gmra.mrb[112].mxu0 %vm1720_vm0, %v3662_v62 }
  0xec   :  { %3398 = vmatprep.mubr.msk.bf16.mxu0 %vm1720_vm0, %v3665_v0 }
  0xed   :  { %v3152_v2 = vpop.f32.mrb[0].mxu1 }
  0xee   :  { %v1956_v4 = vadd.f32 %v3284_v52, %v3152_v2  ;;  %v877_v5 = vpop.f32.mrb[1].mxu1  ;;  %v3292_v15 = vpop.f32.mrb[8].mxu0 }
  0xef   :  { %v1948_v7 = vadd.f32 %v1947_v53, %v877_v5  ;;  %v3153_v8 = vpop.f32.mrb[2].mxu1  ;;  %v1979_v17 = vpop.f32.mrb[9].mxu0  ;;  %v3675_v5 = vld [vmem:[%s4550_s1 + $0x1f0] sm:$0xff]  }
  0xf0   :  { %v2467_v10 = vadd.f32 %v4216_v3, %v1956_v4  ;;  %v1959_v11 = vadd.f32 %v3285_v55, %v3153_v8  ;;  %v880_v12 = vpop.f32.mrb[3].mxu1  ;;  %v3293_v20 = vpop.f32.mrb[10].mxu0 }
  0xf1   :  { %v2465_v13 = vadd.f32 %v4216_v3, %v1948_v7  ;;  %v1951_v14 = vadd.f32 %v1950_v57, %v880_v12  ;;  %v1982_v22 = vpop.f32.mrb[11].mxu0 }
  0xf2   :  { %2595 = vst.msk [vmem:[#allocation2 + $0x10] sm:$0xff] %vm1720_vm0, %v2467_v10  ;;  %v2468_v16 = vadd.f32 %v4216_v3, %v1959_v11  ;;  %3259 = vmatmul.mubr.msk.bf16.gmra.mrb[108].mxu1 %vm650_vm1, %v3660_v6 }
  0xf3   :  { %2593 = vst.msk [vmem:[#allocation2] sm:$0xff] %vm1720_vm0, %v2465_v13  ;;  %v2466_v19 = vadd.f32 %v4216_v3, %v1951_v14  ;;  %3262 = vmatprep.mubr.msk.bf16.mxu1 %vm650_vm1, %v3663_v9  ;;  %3399 = vmatmul.mubr.msk.bf16.gmra.mrb[116].mxu0 %vm1720_vm0, %v3666_v18 }
  0xf4   :  { %2596 = vst.msk [vmem:[#allocation2 + $0x18] sm:$0xff] %vm1720_vm0, %v2468_v16  ;;  %3402 = vmatprep.mubr.msk.bf16.mxu0 %vm1720_vm0, %v3669_v21 }
  0xf5   :  { %2594 = vst.msk [vmem:[#allocation2 + $0x8] sm:$0xff] %vm1720_vm0, %v2466_v19  ;;  %v3156_v23 = vpop.f32.mrb[4].mxu1 }
  0xf6   :  { %v1972_v24 = vadd.f32 %v3288_v60, %v3156_v23  ;;  %v893_v25 = vpop.f32.mrb[5].mxu1  ;;  %v3296_v35 = vpop.f32.mrb[12].mxu0 }
  0xf7   :  { %v1964_v27 = vadd.f32 %v1963_v61, %v893_v25  ;;  %v3157_v28 = vpop.f32.mrb[6].mxu1  ;;  %v1995_v37 = vpop.f32.mrb[13].mxu0 }
  0xf8   :  { %v2471_v30 = vadd.f32 %v4216_v3, %v1972_v24  ;;  %v1975_v31 = vadd.f32 %v3289_v63, %v3157_v28  ;;  %v896_v32 = vpop.f32.mrb[7].mxu1  ;;  %v3297_v40 = vpop.f32.mrb[14].mxu0 }
  0xf9   :  { %v2469_v33 = vadd.f32 %v4216_v3, %v1964_v27  ;;  %v1967_v34 = vadd.f32 %v1966_v1, %v896_v32  ;;  %v1998_v42 = vpop.f32.mrb[15].mxu0  ;;  %v3672_v1 = vld [vmem:[%s4550_s1 + $0x1e8] sm:$0xff]  }
  0xfa   :  { %2599 = vst.msk [vmem:[#allocation2 + $0x30] sm:$0xff] %vm1720_vm0, %v2471_v30  ;;  %v2472_v36 = vadd.f32 %v4216_v3, %v1975_v31  ;;  %3263 = vmatmul.mubr.msk.bf16.gmra.mrb[112].mxu1 %vm650_vm1, %v3664_v26 }
  0xfb   :  { %2597 = vst.msk [vmem:[#allocation2 + $0x20] sm:$0xff] %vm1720_vm0, %v2469_v33  ;;  %v2470_v39 = vadd.f32 %v4216_v3, %v1967_v34  ;;  %3266 = vmatprep.mubr.msk.bf16.mxu1 %vm650_vm1, %v3667_v29  ;;  %3403 = vmatmul.mubr.msk.bf16.gmra.mrb[120].mxu0 %vm1720_vm0, %v3670_v38 }
  0xfc   :  { %2600 = vst.msk [vmem:[#allocation2 + $0x38] sm:$0xff] %vm1720_vm0, %v2472_v36  ;;  %3406 = vmatprep.mubr.msk.bf16.mxu0 %vm1720_vm0, %v3673_v41 }
  0xfd   :  { %2598 = vst.msk [vmem:[#allocation2 + $0x28] sm:$0xff] %vm1720_vm0, %v2470_v39  ;;  %v3160_v43 = vpop.f32.mrb[8].mxu1 }
  0xfe   :  { %v1988_v44 = vadd.f32 %v3292_v15, %v3160_v43  ;;  %v909_v45 = vpop.f32.mrb[9].mxu1  ;;  %v3300_v55 = vpop.f32.mrb[16].mxu0 }
  0xff   :  { %v1980_v47 = vadd.f32 %v1979_v17, %v909_v45  ;;  %v3161_v48 = vpop.f32.mrb[10].mxu1  ;;  %v2011_v57 = vpop.f32.mrb[17].mxu0 }
 0x100   :  { %v2475_v50 = vadd.f32 %v4216_v3, %v1988_v44  ;;  %v1991_v51 = vadd.f32 %v3293_v20, %v3161_v48  ;;  %v912_v52 = vpop.f32.mrb[11].mxu1  ;;  %v3301_v60 = vpop.f32.mrb[18].mxu0  ;;  %v3676_v20 = vld [vmem:[%s4550_s1 + $0x1f8] sm:$0xff]  }
 0x101   :  { %v2473_v53 = vadd.f32 %v4216_v3, %v1980_v47  ;;  %v1983_v54 = vadd.f32 %v1982_v22, %v912_v52  ;;  %v2014_v61 = vpop.f32.mrb[19].mxu0 }
 0x102   :  { %2603 = vst.msk [vmem:[#allocation2 + $0x50] sm:$0xff] %vm1720_vm0, %v2475_v50  ;;  %v2476_v56 = vadd.f32 %v4216_v3, %v1991_v51  ;;  %3267 = vmatmul.mubr.msk.bf16.gmra.mrb[116].mxu1 %vm650_vm1, %v3668_v46 }
 0x103   :  { %2601 = vst.msk [vmem:[#allocation2 + $0x40] sm:$0xff] %vm1720_vm0, %v2473_v53  ;;  %v2474_v59 = vadd.f32 %v4216_v3, %v1983_v54  ;;  %3270 = vmatprep.mubr.msk.bf16.mxu1 %vm650_vm1, %v3671_v49  ;;  %3407 = vmatmul.mubr.msk.bf16.gmra.mrb[124].mxu0 %vm1720_vm0, %v3674_v58 }
 0x104   :  { %2604 = vst.msk [vmem:[#allocation2 + $0x58] sm:$0xff] %vm1720_vm0, %v2476_v56 }
 0x105   :  { %2602 = vst.msk [vmem:[#allocation2 + $0x48] sm:$0xff] %vm1720_vm0, %v2474_v59  ;;  %v3164_v62 = vpop.f32.mrb[12].mxu1 }
 0x106   :  { %v2004_v63 = vadd.f32 %v3296_v35, %v3164_v62  ;;  %v925_v0 = vpop.f32.mrb[13].mxu1  ;;  %v3304_v11 = vpop.f32.mrb[20].mxu0 }
 0x107   :  { %v1996_v2 = vadd.f32 %v1995_v37, %v925_v0  ;;  %v3165_v4 = vpop.f32.mrb[14].mxu1  ;;  %v2027_v13 = vpop.f32.mrb[21].mxu0 }
 0x108   :  { %v2479_v6 = vadd.f32 %v4216_v3, %v2004_v63  ;;  %v2007_v7 = vadd.f32 %v3297_v40, %v3165_v4  ;;  %v928_v8 = vpop.f32.mrb[15].mxu1  ;;  %v3305_v15 = vpop.f32.mrb[22].mxu0 }
 0x109   :  { %v2477_v9 = vadd.f32 %v4216_v3, %v1996_v2  ;;  %v1999_v10 = vadd.f32 %v1998_v42, %v928_v8  ;;  %v2030_v16 = vpop.f32.mrb[23].mxu0 }
 0x10a   :  { %2607 = vst.msk [vmem:[#allocation2 + $0x70] sm:$0xff] %vm1720_vm0, %v2479_v6  ;;  %v2480_v12 = vadd.f32 %v4216_v3, %v2007_v7  ;;  %3271 = vmatmul.mubr.msk.bf16.gmra.mrb[120].mxu1 %vm650_vm1, %v3672_v1 }
 0x10b   :  { %2605 = vst.msk [vmem:[#allocation2 + $0x60] sm:$0xff] %vm1720_vm0, %v2477_v9  ;;  %v2478_v14 = vadd.f32 %v4216_v3, %v1999_v10  ;;  %3274 = vmatprep.mubr.msk.bf16.mxu1 %vm650_vm1, %v3675_v5 }
 0x10c   :  { %2608 = vst.msk [vmem:[#allocation2 + $0x78] sm:$0xff] %vm1720_vm0, %v2480_v12 }
 0x10d   :  { %2606 = vst.msk [vmem:[#allocation2 + $0x68] sm:$0xff] %vm1720_vm0, %v2478_v14  ;;  %v3168_v17 = vpop.f32.mrb[16].mxu1 }
 0x10e   :  { %v2020_v18 = vadd.f32 %v3300_v55, %v3168_v17  ;;  %v941_v19 = vpop.f32.mrb[17].mxu1  ;;  %v3308_v28 = vpop.f32.mrb[24].mxu0 }
 0x10f   :  { %v2012_v21 = vadd.f32 %v2011_v57, %v941_v19  ;;  %v3169_v22 = vpop.f32.mrb[18].mxu1  ;;  %v2043_v30 = vpop.f32.mrb[25].mxu0 }
 0x110   :  { %v2483_v23 = vadd.f32 %v4216_v3, %v2020_v18  ;;  %v2023_v24 = vadd.f32 %v3301_v60, %v3169_v22  ;;  %v944_v25 = vpop.f32.mrb[19].mxu1  ;;  %v3309_v32 = vpop.f32.mrb[26].mxu0 }
 0x111   :  { %v2481_v26 = vadd.f32 %v4216_v3, %v2012_v21  ;;  %v2015_v27 = vadd.f32 %v2014_v61, %v944_v25  ;;  %v2046_v33 = vpop.f32.mrb[27].mxu0 }
 0x112   :  { %2611 = vst.msk [vmem:[#allocation2 + $0x90] sm:$0xff] %vm1720_vm0, %v2483_v23  ;;  %v2484_v29 = vadd.f32 %v4216_v3, %v2023_v24  ;;  %3275 = vmatmul.mubr.msk.bf16.gmra.mrb[124].mxu1 %vm650_vm1, %v3676_v20 }
 0x113   :  { %2609 = vst.msk [vmem:[#allocation2 + $0x80] sm:$0xff] %vm1720_vm0, %v2481_v26  ;;  %v2482_v31 = vadd.f32 %v4216_v3, %v2015_v27 }
 0x114   :  { %2612 = vst.msk [vmem:[#allocation2 + $0x98] sm:$0xff] %vm1720_vm0, %v2484_v29 }
 0x115   :  { %2610 = vst.msk [vmem:[#allocation2 + $0x88] sm:$0xff] %vm1720_vm0, %v2482_v31  ;;  %v3172_v34 = vpop.f32.mrb[20].mxu1 }
 0x116   :  { %v2036_v35 = vadd.f32 %v3304_v11, %v3172_v34  ;;  %v957_v36 = vpop.f32.mrb[21].mxu1  ;;  %v3312_v44 = vpop.f32.mrb[28].mxu0 }
 0x117   :  { %v2028_v37 = vadd.f32 %v2027_v13, %v957_v36  ;;  %v3173_v38 = vpop.f32.mrb[22].mxu1  ;;  %v2059_v46 = vpop.f32.mrb[29].mxu0 }
 0x118   :  { %v2487_v39 = vadd.f32 %v4216_v3, %v2036_v35  ;;  %v2039_v40 = vadd.f32 %v3305_v15, %v3173_v38  ;;  %v960_v41 = vpop.f32.mrb[23].mxu1  ;;  %v3313_v48 = vpop.f32.mrb[30].mxu0 }
 0x119   :  { %v2485_v42 = vadd.f32 %v4216_v3, %v2028_v37  ;;  %v2031_v43 = vadd.f32 %v2030_v16, %v960_v41  ;;  %v2062_v49 = vpop.f32.mrb[31].mxu0 }
 0x11a   :  { %2615 = vst.msk [vmem:[#allocation2 + $0xb0] sm:$0xff] %vm1720_vm0, %v2487_v39  ;;  %v2488_v45 = vadd.f32 %v4216_v3, %v2039_v40 }
 0x11b   :  { %2613 = vst.msk [vmem:[#allocation2 + $0xa0] sm:$0xff] %vm1720_vm0, %v2485_v42  ;;  %v2486_v47 = vadd.f32 %v4216_v3, %v2031_v43 }
 0x11c   :  { %2616 = vst.msk [vmem:[#allocation2 + $0xb8] sm:$0xff] %vm1720_vm0, %v2488_v45 }
 0x11d   :  { %2614 = vst.msk [vmem:[#allocation2 + $0xa8] sm:$0xff] %vm1720_vm0, %v2486_v47  ;;  %v3176_v50 = vpop.f32.mrb[24].mxu1 }
 0x11e   :  { %v2052_v51 = vadd.f32 %v3308_v28, %v3176_v50  ;;  %v973_v52 = vpop.f32.mrb[25].mxu1  ;;  %v3316_v60 = vpop.f32.mrb[32].mxu0 }
 0x11f   :  { %v2044_v53 = vadd.f32 %v2043_v30, %v973_v52  ;;  %v3177_v54 = vpop.f32.mrb[26].mxu1  ;;  %v2075_v62 = vpop.f32.mrb[33].mxu0 }
 0x120   :  { %v2491_v55 = vadd.f32 %v4216_v3, %v2052_v51  ;;  %v2055_v56 = vadd.f32 %v3309_v32, %v3177_v54  ;;  %v976_v57 = vpop.f32.mrb[27].mxu1  ;;  %v3317_v0 = vpop.f32.mrb[34].mxu0 }
 0x121   :  { %v2489_v58 = vadd.f32 %v4216_v3, %v2044_v53  ;;  %v2047_v59 = vadd.f32 %v2046_v33, %v976_v57  ;;  %v2078_v1 = vpop.f32.mrb[35].mxu0 }
 0x122   :  { %2619 = vst.msk [vmem:[#allocation2 + $0xd0] sm:$0xff] %vm1720_vm0, %v2491_v55  ;;  %v2492_v61 = vadd.f32 %v4216_v3, %v2055_v56 }
 0x123   :  { %2617 = vst.msk [vmem:[#allocation2 + $0xc0] sm:$0xff] %vm1720_vm0, %v2489_v58  ;;  %v2490_v63 = vadd.f32 %v4216_v3, %v2047_v59 }
 0x124   :  { %2620 = vst.msk [vmem:[#allocation2 + $0xd8] sm:$0xff] %vm1720_vm0, %v2492_v61 }
 0x125   :  { %2618 = vst.msk [vmem:[#allocation2 + $0xc8] sm:$0xff] %vm1720_vm0, %v2490_v63  ;;  %v3180_v2 = vpop.f32.mrb[28].mxu1 }
 0x126   :  { %v2068_v4 = vadd.f32 %v3312_v44, %v3180_v2  ;;  %v989_v5 = vpop.f32.mrb[29].mxu1  ;;  %v3320_v13 = vpop.f32.mrb[36].mxu0 }
 0x127   :  { %v2060_v6 = vadd.f32 %v2059_v46, %v989_v5  ;;  %v3181_v7 = vpop.f32.mrb[30].mxu1  ;;  %v2091_v15 = vpop.f32.mrb[37].mxu0 }
 0x128   :  { %v2495_v8 = vadd.f32 %v4216_v3, %v2068_v4  ;;  %v2071_v9 = vadd.f32 %v3313_v48, %v3181_v7  ;;  %v992_v10 = vpop.f32.mrb[31].mxu1  ;;  %v3321_v17 = vpop.f32.mrb[38].mxu0 }
 0x129   :  { %v2493_v11 = vadd.f32 %v4216_v3, %v2060_v6  ;;  %v2063_v12 = vadd.f32 %v2062_v49, %v992_v10  ;;  %v2094_v18 = vpop.f32.mrb[39].mxu0 }
 0x12a   :  { %2623 = vst.msk [vmem:[#allocation2 + $0xf0] sm:$0xff] %vm1720_vm0, %v2495_v8  ;;  %v2496_v14 = vadd.f32 %v4216_v3, %v2071_v9 }
 0x12b   :  { %2621 = vst.msk [vmem:[#allocation2 + $0xe0] sm:$0xff] %vm1720_vm0, %v2493_v11  ;;  %v2494_v16 = vadd.f32 %v4216_v3, %v2063_v12 }
 0x12c   :  { %2624 = vst.msk [vmem:[#allocation2 + $0xf8] sm:$0xff] %vm1720_vm0, %v2496_v14 }
 0x12d   :  { %2622 = vst.msk [vmem:[#allocation2 + $0xe8] sm:$0xff] %vm1720_vm0, %v2494_v16  ;;  %v3184_v19 = vpop.f32.mrb[32].mxu1 }
 0x12e   :  { %v2084_v20 = vadd.f32 %v3316_v60, %v3184_v19  ;;  %v1005_v21 = vpop.f32.mrb[33].mxu1  ;;  %v3324_v29 = vpop.f32.mrb[40].mxu0 }
 0x12f   :  { %v2076_v22 = vadd.f32 %v2075_v62, %v1005_v21  ;;  %v3185_v23 = vpop.f32.mrb[34].mxu1  ;;  %v2107_v31 = vpop.f32.mrb[41].mxu0 }
 0x130   :  { %v2499_v24 = vadd.f32 %v4216_v3, %v2084_v20  ;;  %v2087_v25 = vadd.f32 %v3317_v0, %v3185_v23  ;;  %v1008_v26 = vpop.f32.mrb[35].mxu1  ;;  %v3325_v33 = vpop.f32.mrb[42].mxu0 }
 0x131   :  { %v2497_v27 = vadd.f32 %v4216_v3, %v2076_v22  ;;  %v2079_v28 = vadd.f32 %v2078_v1, %v1008_v26  ;;  %v2110_v34 = vpop.f32.mrb[43].mxu0 }
 0x132   :  { %2627 = vst.msk [vmem:[#allocation2 + $0x110] sm:$0xff] %vm1720_vm0, %v2499_v24  ;;  %v2500_v30 = vadd.f32 %v4216_v3, %v2087_v25 }
 0x133   :  { %2625 = vst.msk [vmem:[#allocation2 + $0x100] sm:$0xff] %vm1720_vm0, %v2497_v27  ;;  %v2498_v32 = vadd.f32 %v4216_v3, %v2079_v28 }
 0x134   :  { %2628 = vst.msk [vmem:[#allocation2 + $0x118] sm:$0xff] %vm1720_vm0, %v2500_v30 }
 0x135   :  { %2626 = vst.msk [vmem:[#allocation2 + $0x108] sm:$0xff] %vm1720_vm0, %v2498_v32  ;;  %v3188_v35 = vpop.f32.mrb[36].mxu1 }
 0x136   :  { %v2100_v36 = vadd.f32 %v3320_v13, %v3188_v35  ;;  %v1021_v37 = vpop.f32.mrb[37].mxu1  ;;  %v3328_v45 = vpop.f32.mrb[44].mxu0 }
 0x137   :  { %v2092_v38 = vadd.f32 %v2091_v15, %v1021_v37  ;;  %v3189_v39 = vpop.f32.mrb[38].mxu1  ;;  %v2123_v47 = vpop.f32.mrb[45].mxu0 }
 0x138   :  { %v2503_v40 = vadd.f32 %v4216_v3, %v2100_v36  ;;  %v2103_v41 = vadd.f32 %v3321_v17, %v3189_v39  ;;  %v1024_v42 = vpop.f32.mrb[39].mxu1  ;;  %v3329_v49 = vpop.f32.mrb[46].mxu0 }
 0x139   :  { %v2501_v43 = vadd.f32 %v4216_v3, %v2092_v38  ;;  %v2095_v44 = vadd.f32 %v2094_v18, %v1024_v42  ;;  %v2126_v50 = vpop.f32.mrb[47].mxu0 }
 0x13a   :  { %2631 = vst.msk [vmem:[#allocation2 + $0x130] sm:$0xff] %vm1720_vm0, %v2503_v40  ;;  %v2504_v46 = vadd.f32 %v4216_v3, %v2103_v41 }
 0x13b   :  { %2629 = vst.msk [vmem:[#allocation2 + $0x120] sm:$0xff] %vm1720_vm0, %v2501_v43  ;;  %v2502_v48 = vadd.f32 %v4216_v3, %v2095_v44 }
 0x13c   :  { %2632 = vst.msk [vmem:[#allocation2 + $0x138] sm:$0xff] %vm1720_vm0, %v2504_v46 }
 0x13d   :  { %2630 = vst.msk [vmem:[#allocation2 + $0x128] sm:$0xff] %vm1720_vm0, %v2502_v48  ;;  %v3192_v51 = vpop.f32.mrb[40].mxu1 }
 0x13e   :  { %v2116_v52 = vadd.f32 %v3324_v29, %v3192_v51  ;;  %v1037_v53 = vpop.f32.mrb[41].mxu1  ;;  %v3332_v61 = vpop.f32.mrb[48].mxu0 }
 0x13f   :  { %v2108_v54 = vadd.f32 %v2107_v31, %v1037_v53  ;;  %v3193_v55 = vpop.f32.mrb[42].mxu1  ;;  %v2139_v63 = vpop.f32.mrb[49].mxu0 }
 0x140   :  { %v2507_v56 = vadd.f32 %v4216_v3, %v2116_v52  ;;  %v2119_v57 = vadd.f32 %v3325_v33, %v3193_v55  ;;  %v1040_v58 = vpop.f32.mrb[43].mxu1  ;;  %v3333_v1 = vpop.f32.mrb[50].mxu0 }
 0x141   :  { %v2505_v59 = vadd.f32 %v4216_v3, %v2108_v54  ;;  %v2111_v60 = vadd.f32 %v2110_v34, %v1040_v58  ;;  %v2142_v2 = vpop.f32.mrb[51].mxu0 }
 0x142   :  { %2635 = vst.msk [vmem:[#allocation2 + $0x150] sm:$0xff] %vm1720_vm0, %v2507_v56  ;;  %v2508_v62 = vadd.f32 %v4216_v3, %v2119_v57 }
 0x143   :  { %2633 = vst.msk [vmem:[#allocation2 + $0x140] sm:$0xff] %vm1720_vm0, %v2505_v59  ;;  %v2506_v0 = vadd.f32 %v4216_v3, %v2111_v60 }
 0x144   :  { %2636 = vst.msk [vmem:[#allocation2 + $0x158] sm:$0xff] %vm1720_vm0, %v2508_v62 }
 0x145   :  { %2634 = vst.msk [vmem:[#allocation2 + $0x148] sm:$0xff] %vm1720_vm0, %v2506_v0  ;;  %v3196_v4 = vpop.f32.mrb[44].mxu1 }
 0x146   :  { %v2132_v5 = vadd.f32 %v3328_v45, %v3196_v4  ;;  %v1053_v6 = vpop.f32.mrb[45].mxu1  ;;  %v3336_v14 = vpop.f32.mrb[52].mxu0 }
 0x147   :  { %v2124_v7 = vadd.f32 %v2123_v47, %v1053_v6  ;;  %v3197_v8 = vpop.f32.mrb[46].mxu1  ;;  %v2155_v16 = vpop.f32.mrb[53].mxu0 }
 0x148   :  { %v2511_v9 = vadd.f32 %v4216_v3, %v2132_v5  ;;  %v2135_v10 = vadd.f32 %v3329_v49, %v3197_v8  ;;  %v1056_v11 = vpop.f32.mrb[47].mxu1  ;;  %v3337_v18 = vpop.f32.mrb[54].mxu0 }
 0x149   :  { %v2509_v12 = vadd.f32 %v4216_v3, %v2124_v7  ;;  %v2127_v13 = vadd.f32 %v2126_v50, %v1056_v11  ;;  %v2158_v19 = vpop.f32.mrb[55].mxu0 }
 0x14a   :  { %2639 = vst.msk [vmem:[#allocation2 + $0x170] sm:$0xff] %vm1720_vm0, %v2511_v9  ;;  %v2512_v15 = vadd.f32 %v4216_v3, %v2135_v10 }
 0x14b   :  { %2637 = vst.msk [vmem:[#allocation2 + $0x160] sm:$0xff] %vm1720_vm0, %v2509_v12  ;;  %v2510_v17 = vadd.f32 %v4216_v3, %v2127_v13 }
 0x14c   :  { %2640 = vst.msk [vmem:[#allocation2 + $0x178] sm:$0xff] %vm1720_vm0, %v2512_v15 }
 0x14d   :  { %2638 = vst.msk [vmem:[#allocation2 + $0x168] sm:$0xff] %vm1720_vm0, %v2510_v17  ;;  %v3200_v20 = vpop.f32.mrb[48].mxu1 }
 0x14e   :  { %v2148_v21 = vadd.f32 %v3332_v61, %v3200_v20  ;;  %v1069_v22 = vpop.f32.mrb[49].mxu1  ;;  %v3340_v30 = vpop.f32.mrb[56].mxu0 }
 0x14f   :  { %v2140_v23 = vadd.f32 %v2139_v63, %v1069_v22  ;;  %v3201_v24 = vpop.f32.mrb[50].mxu1  ;;  %v2171_v32 = vpop.f32.mrb[57].mxu0 }
 0x150   :  { %v2515_v25 = vadd.f32 %v4216_v3, %v2148_v21  ;;  %v2151_v26 = vadd.f32 %v3333_v1, %v3201_v24  ;;  %v1072_v27 = vpop.f32.mrb[51].mxu1  ;;  %v3341_v34 = vpop.f32.mrb[58].mxu0 }
 0x151   :  { %v2513_v28 = vadd.f32 %v4216_v3, %v2140_v23  ;;  %v2143_v29 = vadd.f32 %v2142_v2, %v1072_v27  ;;  %v2174_v35 = vpop.f32.mrb[59].mxu0 }
 0x152   :  { %2643 = vst.msk [vmem:[#allocation2 + $0x190] sm:$0xff] %vm1720_vm0, %v2515_v25  ;;  %v2516_v31 = vadd.f32 %v4216_v3, %v2151_v26 }
 0x153   :  { %2641 = vst.msk [vmem:[#allocation2 + $0x180] sm:$0xff] %vm1720_vm0, %v2513_v28  ;;  %v2514_v33 = vadd.f32 %v4216_v3, %v2143_v29 }
 0x154   :  { %2644 = vst.msk [vmem:[#allocation2 + $0x198] sm:$0xff] %vm1720_vm0, %v2516_v31 }
 0x155   :  { %2642 = vst.msk [vmem:[#allocation2 + $0x188] sm:$0xff] %vm1720_vm0, %v2514_v33  ;;  %v3204_v36 = vpop.f32.mrb[52].mxu1 }
 0x156   :  { %v2164_v37 = vadd.f32 %v3336_v14, %v3204_v36  ;;  %v1085_v38 = vpop.f32.mrb[53].mxu1  ;;  %v3344_v46 = vpop.f32.mrb[60].mxu0 }
 0x157   :  { %v2156_v39 = vadd.f32 %v2155_v16, %v1085_v38  ;;  %v3205_v40 = vpop.f32.mrb[54].mxu1  ;;  %v2187_v48 = vpop.f32.mrb[61].mxu0 }
 0x158   :  { %v2519_v41 = vadd.f32 %v4216_v3, %v2164_v37  ;;  %v2167_v42 = vadd.f32 %v3337_v18, %v3205_v40  ;;  %v1088_v43 = vpop.f32.mrb[55].mxu1  ;;  %v3345_v50 = vpop.f32.mrb[62].mxu0 }
 0x159   :  { %v2517_v44 = vadd.f32 %v4216_v3, %v2156_v39  ;;  %v2159_v45 = vadd.f32 %v2158_v19, %v1088_v43  ;;  %v2190_v51 = vpop.f32.mrb[63].mxu0 }
 0x15a   :  { %2647 = vst.msk [vmem:[#allocation2 + $0x1b0] sm:$0xff] %vm1720_vm0, %v2519_v41  ;;  %v2520_v47 = vadd.f32 %v4216_v3, %v2167_v42 }
 0x15b   :  { %2645 = vst.msk [vmem:[#allocation2 + $0x1a0] sm:$0xff] %vm1720_vm0, %v2517_v44  ;;  %v2518_v49 = vadd.f32 %v4216_v3, %v2159_v45 }
 0x15c   :  { %2648 = vst.msk [vmem:[#allocation2 + $0x1b8] sm:$0xff] %vm1720_vm0, %v2520_v47 }
 0x15d   :  { %2646 = vst.msk [vmem:[#allocation2 + $0x1a8] sm:$0xff] %vm1720_vm0, %v2518_v49  ;;  %v3208_v52 = vpop.f32.mrb[56].mxu1 }
 0x15e   :  { %v2180_v53 = vadd.f32 %v3340_v30, %v3208_v52  ;;  %v1101_v54 = vpop.f32.mrb[57].mxu1  ;;  %v3348_v62 = vpop.f32.mrb[64].mxu0 }
 0x15f   :  { %v2172_v55 = vadd.f32 %v2171_v32, %v1101_v54  ;;  %v3209_v56 = vpop.f32.mrb[58].mxu1  ;;  %v2203_v0 = vpop.f32.mrb[65].mxu0 }
 0x160   :  { %v2523_v57 = vadd.f32 %v4216_v3, %v2180_v53  ;;  %v2183_v58 = vadd.f32 %v3341_v34, %v3209_v56  ;;  %v1104_v59 = vpop.f32.mrb[59].mxu1  ;;  %v3349_v2 = vpop.f32.mrb[66].mxu0 }
 0x161   :  { %v2521_v60 = vadd.f32 %v4216_v3, %v2172_v55  ;;  %v2175_v61 = vadd.f32 %v2174_v35, %v1104_v59  ;;  %v2206_v4 = vpop.f32.mrb[67].mxu0 }
 0x162   :  { %2651 = vst.msk [vmem:[#allocation2 + $0x1d0] sm:$0xff] %vm1720_vm0, %v2523_v57  ;;  %v2524_v63 = vadd.f32 %v4216_v3, %v2183_v58 }
 0x163   :  { %2649 = vst.msk [vmem:[#allocation2 + $0x1c0] sm:$0xff] %vm1720_vm0, %v2521_v60  ;;  %v2522_v1 = vadd.f32 %v4216_v3, %v2175_v61 }
 0x164   :  { %2652 = vst.msk [vmem:[#allocation2 + $0x1d8] sm:$0xff] %vm1720_vm0, %v2524_v63 }
 0x165   :  { %2650 = vst.msk [vmem:[#allocation2 + $0x1c8] sm:$0xff] %vm1720_vm0, %v2522_v1  ;;  %v3212_v5 = vpop.f32.mrb[60].mxu1 }
 0x166   :  { %v2196_v6 = vadd.f32 %v3344_v46, %v3212_v5  ;;  %v1117_v7 = vpop.f32.mrb[61].mxu1  ;;  %v3352_v15 = vpop.f32.mrb[68].mxu0 }
 0x167   :  { %v2188_v8 = vadd.f32 %v2187_v48, %v1117_v7  ;;  %v3213_v9 = vpop.f32.mrb[62].mxu1  ;;  %v2219_v17 = vpop.f32.mrb[69].mxu0 }
 0x168   :  { %v2527_v10 = vadd.f32 %v4216_v3, %v2196_v6  ;;  %v2199_v11 = vadd.f32 %v3345_v50, %v3213_v9  ;;  %v1120_v12 = vpop.f32.mrb[63].mxu1  ;;  %v3353_v19 = vpop.f32.mrb[70].mxu0 }
 0x169   :  { %v2525_v13 = vadd.f32 %v4216_v3, %v2188_v8  ;;  %v2191_v14 = vadd.f32 %v2190_v51, %v1120_v12  ;;  %v2222_v20 = vpop.f32.mrb[71].mxu0 }
 0x16a   :  { %2655 = vst.msk [vmem:[#allocation2 + $0x1f0] sm:$0xff] %vm1720_vm0, %v2527_v10  ;;  %v2528_v16 = vadd.f32 %v4216_v3, %v2199_v11 }
 0x16b   :  { %2653 = vst.msk [vmem:[#allocation2 + $0x1e0] sm:$0xff] %vm1720_vm0, %v2525_v13  ;;  %v2526_v18 = vadd.f32 %v4216_v3, %v2191_v14 }
 0x16c   :  { %2656 = vst.msk [vmem:[#allocation2 + $0x1f8] sm:$0xff] %vm1720_vm0, %v2528_v16 }
 0x16d   :  { %2654 = vst.msk [vmem:[#allocation2 + $0x1e8] sm:$0xff] %vm1720_vm0, %v2526_v18  ;;  %v3216_v21 = vpop.f32.mrb[64].mxu1 }
 0x16e   :  { %v2212_v22 = vadd.f32 %v3348_v62, %v3216_v21  ;;  %v1133_v23 = vpop.f32.mrb[65].mxu1  ;;  %v3356_v31 = vpop.f32.mrb[72].mxu0 }
 0x16f   :  { %v2204_v24 = vadd.f32 %v2203_v0, %v1133_v23  ;;  %v3217_v25 = vpop.f32.mrb[66].mxu1  ;;  %v2235_v33 = vpop.f32.mrb[73].mxu0 }
 0x170   :  { %v2531_v26 = vadd.f32 %v4216_v3, %v2212_v22  ;;  %v2215_v27 = vadd.f32 %v3349_v2, %v3217_v25  ;;  %v1136_v28 = vpop.f32.mrb[67].mxu1  ;;  %v3357_v35 = vpop.f32.mrb[74].mxu0 }
 0x171   :  { %v2529_v29 = vadd.f32 %v4216_v3, %v2204_v24  ;;  %v2207_v30 = vadd.f32 %v2206_v4, %v1136_v28  ;;  %v2238_v36 = vpop.f32.mrb[75].mxu0 }
 0x172   :  { %2659 = vst.msk [vmem:[#allocation2 + $0x210] sm:$0xff] %vm1720_vm0, %v2531_v26  ;;  %v2532_v32 = vadd.f32 %v4216_v3, %v2215_v27 }
 0x173   :  { %2657 = vst.msk [vmem:[#allocation2 + $0x200] sm:$0xff] %vm1720_vm0, %v2529_v29  ;;  %v2530_v34 = vadd.f32 %v4216_v3, %v2207_v30 }
 0x174   :  { %2660 = vst.msk [vmem:[#allocation2 + $0x218] sm:$0xff] %vm1720_vm0, %v2532_v32 }
 0x175   :  { %2658 = vst.msk [vmem:[#allocation2 + $0x208] sm:$0xff] %vm1720_vm0, %v2530_v34  ;;  %v3220_v37 = vpop.f32.mrb[68].mxu1 }
 0x176   :  { %v2228_v38 = vadd.f32 %v3352_v15, %v3220_v37  ;;  %v1149_v39 = vpop.f32.mrb[69].mxu1  ;;  %v3360_v47 = vpop.f32.mrb[76].mxu0 }
 0x177   :  { %v2220_v40 = vadd.f32 %v2219_v17, %v1149_v39  ;;  %v3221_v41 = vpop.f32.mrb[70].mxu1  ;;  %v2251_v49 = vpop.f32.mrb[77].mxu0 }
 0x178   :  { %v2535_v42 = vadd.f32 %v4216_v3, %v2228_v38  ;;  %v2231_v43 = vadd.f32 %v3353_v19, %v3221_v41  ;;  %v1152_v44 = vpop.f32.mrb[71].mxu1  ;;  %v3361_v51 = vpop.f32.mrb[78].mxu0 }
 0x179   :  { %v2533_v45 = vadd.f32 %v4216_v3, %v2220_v40  ;;  %v2223_v46 = vadd.f32 %v2222_v20, %v1152_v44  ;;  %v2254_v52 = vpop.f32.mrb[79].mxu0 }
 0x17a   :  { %2663 = vst.msk [vmem:[#allocation2 + $0x230] sm:$0xff] %vm1720_vm0, %v2535_v42  ;;  %v2536_v48 = vadd.f32 %v4216_v3, %v2231_v43 }
 0x17b   :  { %2661 = vst.msk [vmem:[#allocation2 + $0x220] sm:$0xff] %vm1720_vm0, %v2533_v45  ;;  %v2534_v50 = vadd.f32 %v4216_v3, %v2223_v46 }
 0x17c   :  { %2664 = vst.msk [vmem:[#allocation2 + $0x238] sm:$0xff] %vm1720_vm0, %v2536_v48 }
 0x17d   :  { %2662 = vst.msk [vmem:[#allocation2 + $0x228] sm:$0xff] %vm1720_vm0, %v2534_v50  ;;  %v3224_v53 = vpop.f32.mrb[72].mxu1 }
 0x17e   :  { %v2244_v54 = vadd.f32 %v3356_v31, %v3224_v53  ;;  %v1165_v55 = vpop.f32.mrb[73].mxu1  ;;  %v3364_v63 = vpop.f32.mrb[80].mxu0 }
 0x17f   :  { %v2236_v56 = vadd.f32 %v2235_v33, %v1165_v55  ;;  %v3225_v57 = vpop.f32.mrb[74].mxu1  ;;  %v2267_v1 = vpop.f32.mrb[81].mxu0 }
 0x180   :  { %v2539_v58 = vadd.f32 %v4216_v3, %v2244_v54  ;;  %v2247_v59 = vadd.f32 %v3357_v35, %v3225_v57  ;;  %v1168_v60 = vpop.f32.mrb[75].mxu1  ;;  %v3365_v4 = vpop.f32.mrb[82].mxu0 }
 0x181   :  { %v2537_v61 = vadd.f32 %v4216_v3, %v2236_v56  ;;  %v2239_v62 = vadd.f32 %v2238_v36, %v1168_v60  ;;  %v2270_v5 = vpop.f32.mrb[83].mxu0 }
 0x182   :  { %2667 = vst.msk [vmem:[#allocation2 + $0x250] sm:$0xff] %vm1720_vm0, %v2539_v58  ;;  %v2540_v0 = vadd.f32 %v4216_v3, %v2247_v59 }
 0x183   :  { %2665 = vst.msk [vmem:[#allocation2 + $0x240] sm:$0xff] %vm1720_vm0, %v2537_v61  ;;  %v2538_v2 = vadd.f32 %v4216_v3, %v2239_v62 }
 0x184   :  { %2668 = vst.msk [vmem:[#allocation2 + $0x258] sm:$0xff] %vm1720_vm0, %v2540_v0 }
 0x185   :  { %2666 = vst.msk [vmem:[#allocation2 + $0x248] sm:$0xff] %vm1720_vm0, %v2538_v2  ;;  %v3228_v6 = vpop.f32.mrb[76].mxu1 }
 0x186   :  { %v2260_v7 = vadd.f32 %v3360_v47, %v3228_v6  ;;  %v1181_v8 = vpop.f32.mrb[77].mxu1  ;;  %v3368_v16 = vpop.f32.mrb[84].mxu0 }
 0x187   :  { %v2252_v9 = vadd.f32 %v2251_v49, %v1181_v8  ;;  %v3229_v10 = vpop.f32.mrb[78].mxu1  ;;  %v2283_v18 = vpop.f32.mrb[85].mxu0 }
 0x188   :  { %v2543_v11 = vadd.f32 %v4216_v3, %v2260_v7  ;;  %v2263_v12 = vadd.f32 %v3361_v51, %v3229_v10  ;;  %v1184_v13 = vpop.f32.mrb[79].mxu1  ;;  %v3369_v20 = vpop.f32.mrb[86].mxu0 }
 0x189   :  { %v2541_v14 = vadd.f32 %v4216_v3, %v2252_v9  ;;  %v2255_v15 = vadd.f32 %v2254_v52, %v1184_v13  ;;  %v2286_v21 = vpop.f32.mrb[87].mxu0 }
 0x18a   :  { %2671 = vst.msk [vmem:[#allocation2 + $0x270] sm:$0xff] %vm1720_vm0, %v2543_v11  ;;  %v2544_v17 = vadd.f32 %v4216_v3, %v2263_v12 }
 0x18b   :  { %2669 = vst.msk [vmem:[#allocation2 + $0x260] sm:$0xff] %vm1720_vm0, %v2541_v14  ;;  %v2542_v19 = vadd.f32 %v4216_v3, %v2255_v15 }
 0x18c   :  { %2672 = vst.msk [vmem:[#allocation2 + $0x278] sm:$0xff] %vm1720_vm0, %v2544_v17 }
 0x18d   :  { %2670 = vst.msk [vmem:[#allocation2 + $0x268] sm:$0xff] %vm1720_vm0, %v2542_v19  ;;  %v3232_v22 = vpop.f32.mrb[80].mxu1 }
 0x18e   :  { %v2276_v23 = vadd.f32 %v3364_v63, %v3232_v22  ;;  %v1197_v24 = vpop.f32.mrb[81].mxu1  ;;  %v3372_v32 = vpop.f32.mrb[88].mxu0 }
 0x18f   :  { %v2268_v25 = vadd.f32 %v2267_v1, %v1197_v24  ;;  %v3233_v26 = vpop.f32.mrb[82].mxu1  ;;  %v2299_v34 = vpop.f32.mrb[89].mxu0 }
 0x190   :  { %v2547_v27 = vadd.f32 %v4216_v3, %v2276_v23  ;;  %v2279_v28 = vadd.f32 %v3365_v4, %v3233_v26  ;;  %v1200_v29 = vpop.f32.mrb[83].mxu1  ;;  %v3373_v36 = vpop.f32.mrb[90].mxu0 }
 0x191   :  { %v2545_v30 = vadd.f32 %v4216_v3, %v2268_v25  ;;  %v2271_v31 = vadd.f32 %v2270_v5, %v1200_v29  ;;  %v2302_v37 = vpop.f32.mrb[91].mxu0 }
 0x192   :  { %2675 = vst.msk [vmem:[#allocation2 + $0x290] sm:$0xff] %vm1720_vm0, %v2547_v27  ;;  %v2548_v33 = vadd.f32 %v4216_v3, %v2279_v28  ;;  %v4471_v28 = vld [vmem:[%s4553_s4] ss:$0 sm:$0xff]  ;;  %s3702_s4 = smov [#allocation2]  }
 0x193   :  { %2673 = vst.msk [vmem:[#allocation2 + $0x280] sm:$0xff] %vm1720_vm0, %v2545_v30  ;;  %v2546_v35 = vadd.f32 %v4216_v3, %v2271_v31  ;;  %s2726_s23 = sshll.u32 %s3702_s4, 4  ;;  %s2727_s23 = int_to_ptr.vmem [resolvable:$true] %s2726_s23 }
 0x194   :  { %2676 = vst.msk [vmem:[#allocation2 + $0x298] sm:$0xff] %vm1720_vm0, %v2548_v33  ;;  %s3678_s3 = scalar_lea.vmem %s2727_s23, 16384  ;;  %p3683_p1 = scmp.lt.s32.totalorder %s2727_s23, %s2727_s23 }
 0x195   :  { %2674 = vst.msk [vmem:[#allocation2 + $0x288] sm:$0xff] %vm1720_vm0, %v2546_v35  ;;  %v3236_v38 = vpop.f32.mrb[84].mxu1  ;;  %p3679_p0 = scmp.ne.s32.totalorder %s2727_s23, %s3678_s3  ;;  %p3684_p2 = scmp.lt.s32.totalorder %s3678_s3, %s3678_s3 }
 0x196   :  { %v2292_v39 = vadd.f32 %v3368_v16, %v3236_v38  ;;  %v1213_v40 = vpop.f32.mrb[85].mxu1  ;;  %v3376_v48 = vpop.f32.mrb[92].mxu0 }
 0x197   :  { %v2284_v41 = vadd.f32 %v2283_v18, %v1213_v40  ;;  %v3237_v42 = vpop.f32.mrb[86].mxu1  ;;  %v2315_v50 = vpop.f32.mrb[93].mxu0  ;;  %p3685_p3 = por %p3684_p2, %p3683_p1 }
 0x198   :  { %v2551_v43 = vadd.f32 %v4216_v3, %v2292_v39  ;;  %v2295_v44 = vadd.f32 %v3369_v20, %v3237_v42  ;;  %v1216_v45 = vpop.f32.mrb[87].mxu1  ;;  %v3377_v52 = vpop.f32.mrb[94].mxu0 }
 0x199   :  { %v2549_v46 = vadd.f32 %v4216_v3, %v2284_v41  ;;  %v2287_v47 = vadd.f32 %v2286_v21, %v1216_v45  ;;  %v2318_v53 = vpop.f32.mrb[95].mxu0  ;;  %p3686_p4 = pnand %p3685_p3, %p3679_p0 }
 0x19a   :  { %2679 = vst.msk [vmem:[#allocation2 + $0x2b0] sm:$0xff] %vm1720_vm0, %v2551_v43  ;;  %v2552_v49 = vadd.f32 %v4216_v3, %v2295_v44 }
 0x19b   :  { %2677 = vst.msk [vmem:[#allocation2 + $0x2a0] sm:$0xff] %vm1720_vm0, %v2549_v46  ;;  %v2550_v51 = vadd.f32 %v4216_v3, %v2287_v47 }
 0x19c   :  { %2680 = vst.msk [vmem:[#allocation2 + $0x2b8] sm:$0xff] %vm1720_vm0, %v2552_v49 }
 0x19d   :  { %2678 = vst.msk [vmem:[#allocation2 + $0x2a8] sm:$0xff] %vm1720_vm0, %v2550_v51  ;;  %v3240_v54 = vpop.f32.mrb[88].mxu1 }
 0x19e   :  { %v2308_v55 = vadd.f32 %v3372_v32, %v3240_v54  ;;  %v1229_v56 = vpop.f32.mrb[89].mxu1  ;;  %v3380_v0 = vpop.f32.mrb[96].mxu0 }
 0x19f   :  { %v2300_v57 = vadd.f32 %v2299_v34, %v1229_v56  ;;  %v3241_v58 = vpop.f32.mrb[90].mxu1  ;;  %v2331_v2 = vpop.f32.mrb[97].mxu0 }
 0x1a0   :  { %v2555_v59 = vadd.f32 %v4216_v3, %v2308_v55  ;;  %v2311_v60 = vadd.f32 %v3373_v36, %v3241_v58  ;;  %v1232_v61 = vpop.f32.mrb[91].mxu1  ;;  %v3381_v5 = vpop.f32.mrb[98].mxu0 }
 0x1a1   :  { %v2553_v62 = vadd.f32 %v4216_v3, %v2300_v57  ;;  %v2303_v63 = vadd.f32 %v2302_v37, %v1232_v61  ;;  %v2334_v6 = vpop.f32.mrb[99].mxu0 }
 0x1a2   :  { %2683 = vst.msk [vmem:[#allocation2 + $0x2d0] sm:$0xff] %vm1720_vm0, %v2555_v59  ;;  %v2556_v1 = vadd.f32 %v4216_v3, %v2311_v60 }
 0x1a3   :  { %2681 = vst.msk [vmem:[#allocation2 + $0x2c0] sm:$0xff] %vm1720_vm0, %v2553_v62  ;;  %v2554_v4 = vadd.f32 %v4216_v3, %v2303_v63 }
 0x1a4   :  { %2684 = vst.msk [vmem:[#allocation2 + $0x2d8] sm:$0xff] %vm1720_vm0, %v2556_v1 }
 0x1a5   :  { %2682 = vst.msk [vmem:[#allocation2 + $0x2c8] sm:$0xff] %vm1720_vm0, %v2554_v4  ;;  %v3244_v7 = vpop.f32.mrb[92].mxu1 }
 0x1a6   :  { %v2324_v8 = vadd.f32 %v3376_v48, %v3244_v7  ;;  %v1245_v9 = vpop.f32.mrb[93].mxu1  ;;  %v3384_v17 = vpop.f32.mrb[100].mxu0 }
 0x1a7   :  { %v2316_v10 = vadd.f32 %v2315_v50, %v1245_v9  ;;  %v3245_v11 = vpop.f32.mrb[94].mxu1  ;;  %v2347_v19 = vpop.f32.mrb[101].mxu0 }
 0x1a8   :  { %v2559_v12 = vadd.f32 %v4216_v3, %v2324_v8  ;;  %v2327_v13 = vadd.f32 %v3377_v52, %v3245_v11  ;;  %v1248_v14 = vpop.f32.mrb[95].mxu1  ;;  %v3385_v21 = vpop.f32.mrb[102].mxu0 }
 0x1a9   :  { %v2557_v15 = vadd.f32 %v4216_v3, %v2316_v10  ;;  %v2319_v16 = vadd.f32 %v2318_v53, %v1248_v14  ;;  %v2350_v22 = vpop.f32.mrb[103].mxu0 }
 0x1aa   :  { %2687 = vst.msk [vmem:[#allocation2 + $0x2f0] sm:$0xff] %vm1720_vm0, %v2559_v12  ;;  %v2560_v18 = vadd.f32 %v4216_v3, %v2327_v13 }
 0x1ab   :  { %2685 = vst.msk [vmem:[#allocation2 + $0x2e0] sm:$0xff] %vm1720_vm0, %v2557_v15  ;;  %v2558_v20 = vadd.f32 %v4216_v3, %v2319_v16 }
 0x1ac   :  { %2688 = vst.msk [vmem:[#allocation2 + $0x2f8] sm:$0xff] %vm1720_vm0, %v2560_v18 }
 0x1ad   :  { %2686 = vst.msk [vmem:[#allocation2 + $0x2e8] sm:$0xff] %vm1720_vm0, %v2558_v20  ;;  %v3248_v23 = vpop.f32.mrb[96].mxu1 }
 0x1ae   :  { %v2340_v24 = vadd.f32 %v3380_v0, %v3248_v23  ;;  %v1261_v25 = vpop.f32.mrb[97].mxu1  ;;  %v3388_v33 = vpop.f32.mrb[104].mxu0 }
 0x1af   :  { %v2332_v26 = vadd.f32 %v2331_v2, %v1261_v25  ;;  %v3249_v27 = vpop.f32.mrb[98].mxu1  ;;  %v2363_v35 = vpop.f32.mrb[105].mxu0 }
 0x1b0   :  { %v2563_v29 = vadd.f32 %v4471_v28, %v2340_v24  ;;  %v2343_v30 = vadd.f32 %v3381_v5, %v3249_v27  ;;  %v1264_v3 = vpop.f32.mrb[99].mxu1  ;;  %v3389_v37 = vpop.f32.mrb[106].mxu0 }
 0x1b1   :  { %v2561_v31 = vadd.f32 %v4471_v28, %v2332_v26  ;;  %v2335_v32 = vadd.f32 %v2334_v6, %v1264_v3  ;;  %v2366_v38 = vpop.f32.mrb[107].mxu0 }
 0x1b2   :  { %2691 = vst.msk [vmem:[#allocation2 + $0x310] sm:$0xff] %vm1720_vm0, %v2563_v29  ;;  %v2564_v34 = vadd.f32 %v4471_v28, %v2343_v30 }
 0x1b3   :  { %2689 = vst.msk [vmem:[#allocation2 + $0x300] sm:$0xff] %vm1720_vm0, %v2561_v31  ;;  %v2562_v36 = vadd.f32 %v4471_v28, %v2335_v32 }
 0x1b4   :  { %2692 = vst.msk [vmem:[#allocation2 + $0x318] sm:$0xff] %vm1720_vm0, %v2564_v34 }
 0x1b5   :  { %2690 = vst.msk [vmem:[#allocation2 + $0x308] sm:$0xff] %vm1720_vm0, %v2562_v36  ;;  %v3252_v39 = vpop.f32.mrb[100].mxu1 }
 0x1b6   :  { %v2356_v40 = vadd.f32 %v3384_v17, %v3252_v39  ;;  %v1277_v41 = vpop.f32.mrb[101].mxu1  ;;  %v3392_v49 = vpop.f32.mrb[108].mxu0 }
 0x1b7   :  { %v2348_v42 = vadd.f32 %v2347_v19, %v1277_v41  ;;  %v3253_v43 = vpop.f32.mrb[102].mxu1  ;;  %v2379_v51 = vpop.f32.mrb[109].mxu0 }
 0x1b8   :  { %v2567_v44 = vadd.f32 %v4471_v28, %v2356_v40  ;;  %v2359_v45 = vadd.f32 %v3385_v21, %v3253_v43  ;;  %v1280_v46 = vpop.f32.mrb[103].mxu1  ;;  %v3393_v53 = vpop.f32.mrb[110].mxu0 }
 0x1b9   :  { %v2565_v47 = vadd.f32 %v4471_v28, %v2348_v42  ;;  %v2351_v48 = vadd.f32 %v2350_v22, %v1280_v46  ;;  %v2382_v54 = vpop.f32.mrb[111].mxu0 }
 0x1ba   :  { %2695 = vst.msk [vmem:[#allocation2 + $0x330] sm:$0xff] %vm1720_vm0, %v2567_v44  ;;  %v2568_v50 = vadd.f32 %v4471_v28, %v2359_v45 }
 0x1bb   :  { %2693 = vst.msk [vmem:[#allocation2 + $0x320] sm:$0xff] %vm1720_vm0, %v2565_v47  ;;  %v2566_v52 = vadd.f32 %v4471_v28, %v2351_v48 }
 0x1bc   :  { %2696 = vst.msk [vmem:[#allocation2 + $0x338] sm:$0xff] %vm1720_vm0, %v2568_v50 }
 0x1bd   :  { %2694 = vst.msk [vmem:[#allocation2 + $0x328] sm:$0xff] %vm1720_vm0, %v2566_v52  ;;  %v3256_v55 = vpop.f32.mrb[104].mxu1 }
 0x1be   :  { %v2372_v56 = vadd.f32 %v3388_v33, %v3256_v55  ;;  %v1293_v57 = vpop.f32.mrb[105].mxu1  ;;  %v3396_v1 = vpop.f32.mrb[112].mxu0 }
 0x1bf   :  { %v2364_v58 = vadd.f32 %v2363_v35, %v1293_v57  ;;  %v3257_v59 = vpop.f32.mrb[106].mxu1  ;;  %v2395_v4 = vpop.f32.mrb[113].mxu0 }
 0x1c0   :  { %v2571_v60 = vadd.f32 %v4471_v28, %v2372_v56  ;;  %v2375_v61 = vadd.f32 %v3389_v37, %v3257_v59  ;;  %v1296_v62 = vpop.f32.mrb[107].mxu1  ;;  %v3397_v6 = vpop.f32.mrb[114].mxu0 }
 0x1c1   :  { %v2569_v63 = vadd.f32 %v4471_v28, %v2364_v58  ;;  %v2367_v0 = vadd.f32 %v2366_v38, %v1296_v62  ;;  %v2398_v7 = vpop.f32.mrb[115].mxu0 }
 0x1c2   :  { %2699 = vst.msk [vmem:[#allocation2 + $0x350] sm:$0xff] %vm1720_vm0, %v2571_v60  ;;  %v2572_v2 = vadd.f32 %v4471_v28, %v2375_v61 }
 0x1c3   :  { %2697 = vst.msk [vmem:[#allocation2 + $0x340] sm:$0xff] %vm1720_vm0, %v2569_v63  ;;  %v2570_v5 = vadd.f32 %v4471_v28, %v2367_v0 }
 0x1c4   :  { %2700 = vst.msk [vmem:[#allocation2 + $0x358] sm:$0xff] %vm1720_vm0, %v2572_v2 }
 0x1c5   :  { %2698 = vst.msk [vmem:[#allocation2 + $0x348] sm:$0xff] %vm1720_vm0, %v2570_v5  ;;  %v3260_v8 = vpop.f32.mrb[108].mxu1 }
 0x1c6   :  { %v2388_v9 = vadd.f32 %v3392_v49, %v3260_v8  ;;  %v1309_v10 = vpop.f32.mrb[109].mxu1  ;;  %v3400_v18 = vpop.f32.mrb[116].mxu0 }
 0x1c7   :  { %v2380_v11 = vadd.f32 %v2379_v51, %v1309_v10  ;;  %v3261_v12 = vpop.f32.mrb[110].mxu1  ;;  %v2411_v20 = vpop.f32.mrb[117].mxu0 }
 0x1c8   :  { %v2575_v13 = vadd.f32 %v4471_v28, %v2388_v9  ;;  %v2391_v14 = vadd.f32 %v3393_v53, %v3261_v12  ;;  %v1312_v15 = vpop.f32.mrb[111].mxu1  ;;  %v3401_v22 = vpop.f32.mrb[118].mxu0 }
 0x1c9   :  { %v2573_v16 = vadd.f32 %v4471_v28, %v2380_v11  ;;  %v2383_v17 = vadd.f32 %v2382_v54, %v1312_v15  ;;  %v2414_v23 = vpop.f32.mrb[119].mxu0 }
 0x1ca   :  { %2703 = vst.msk [vmem:[#allocation2 + $0x370] sm:$0xff] %vm1720_vm0, %v2575_v13  ;;  %v2576_v19 = vadd.f32 %v4471_v28, %v2391_v14 }
 0x1cb   :  { %2701 = vst.msk [vmem:[#allocation2 + $0x360] sm:$0xff] %vm1720_vm0, %v2573_v16  ;;  %v2574_v21 = vadd.f32 %v4471_v28, %v2383_v17 }
 0x1cc   :  { %2704 = vst.msk [vmem:[#allocation2 + $0x378] sm:$0xff] %vm1720_vm0, %v2576_v19 }
 0x1cd   :  { %2702 = vst.msk [vmem:[#allocation2 + $0x368] sm:$0xff] %vm1720_vm0, %v2574_v21  ;;  %v3264_v24 = vpop.f32.mrb[112].mxu1 }
 0x1ce   :  { %v2404_v25 = vadd.f32 %v3396_v1, %v3264_v24  ;;  %v1325_v26 = vpop.f32.mrb[113].mxu1  ;;  %v3404_v34 = vpop.f32.mrb[120].mxu0 }
 0x1cf   :  { %v2396_v27 = vadd.f32 %v2395_v4, %v1325_v26  ;;  %v3265_v29 = vpop.f32.mrb[114].mxu1  ;;  %v2427_v36 = vpop.f32.mrb[121].mxu0 }
 0x1d0   :  { %v2579_v30 = vadd.f32 %v4471_v28, %v2404_v25  ;;  %v2407_v3 = vadd.f32 %v3397_v6, %v3265_v29  ;;  %v1328_v31 = vpop.f32.mrb[115].mxu1  ;;  %v3405_v38 = vpop.f32.mrb[122].mxu0 }
 0x1d1   :  { %v2577_v32 = vadd.f32 %v4471_v28, %v2396_v27  ;;  %v2399_v33 = vadd.f32 %v2398_v7, %v1328_v31  ;;  %v2430_v39 = vpop.f32.mrb[123].mxu0 }
 0x1d2   :  { %2707 = vst.msk [vmem:[#allocation2 + $0x390] sm:$0xff] %vm1720_vm0, %v2579_v30  ;;  %v2580_v35 = vadd.f32 %v4471_v28, %v2407_v3 }
 0x1d3   :  { %2705 = vst.msk [vmem:[#allocation2 + $0x380] sm:$0xff] %vm1720_vm0, %v2577_v32  ;;  %v2578_v37 = vadd.f32 %v4471_v28, %v2399_v33 }
 0x1d4   :  { %2708 = vst.msk [vmem:[#allocation2 + $0x398] sm:$0xff] %vm1720_vm0, %v2580_v35 }
 0x1d5   :  { %2706 = vst.msk [vmem:[#allocation2 + $0x388] sm:$0xff] %vm1720_vm0, %v2578_v37  ;;  %v3268_v40 = vpop.f32.mrb[116].mxu1 }
 0x1d6   :  { %v2420_v41 = vadd.f32 %v3400_v18, %v3268_v40  ;;  %v1341_v42 = vpop.f32.mrb[117].mxu1  ;;  %v3408_v50 = vpop.f32.mrb[124].mxu0 }
 0x1d7   :  { %v2412_v43 = vadd.f32 %v2411_v20, %v1341_v42  ;;  %v3269_v44 = vpop.f32.mrb[118].mxu1  ;;  %v2443_v52 = vpop.f32.mrb[125].mxu0 }
 0x1d8   :  { %v2583_v45 = vadd.f32 %v4471_v28, %v2420_v41  ;;  %v2423_v46 = vadd.f32 %v3401_v22, %v3269_v44  ;;  %v1344_v47 = vpop.f32.mrb[119].mxu1  ;;  %v3409_v54 = vpop.f32.mrb[126].mxu0 }
 0x1d9   :  { %v2581_v48 = vadd.f32 %v4471_v28, %v2412_v43  ;;  %v2415_v49 = vadd.f32 %v2414_v23, %v1344_v47  ;;  %v2446_v55 = vpop.f32.mrb[127].mxu0 }
 0x1da   :  { %2711 = vst.msk [vmem:[#allocation2 + $0x3b0] sm:$0xff] %vm1720_vm0, %v2583_v45  ;;  %v2584_v51 = vadd.f32 %v4471_v28, %v2423_v46 }
 0x1db   :  { %2709 = vst.msk [vmem:[#allocation2 + $0x3a0] sm:$0xff] %vm1720_vm0, %v2581_v48  ;;  %v2582_v53 = vadd.f32 %v4471_v28, %v2415_v49 }
 0x1dc   :  { %2712 = vst.msk [vmem:[#allocation2 + $0x3b8] sm:$0xff] %vm1720_vm0, %v2584_v51 }
 0x1dd   :  { %2710 = vst.msk [vmem:[#allocation2 + $0x3a8] sm:$0xff] %vm1720_vm0, %v2582_v53  ;;  %v3272_v56 = vpop.f32.mrb[120].mxu1 }
 0x1de   :  { %v2436_v57 = vadd.f32 %v3404_v34, %v3272_v56  ;;  %v1357_v58 = vpop.f32.mrb[121].mxu1 }
 0x1df   :  { %v2428_v59 = vadd.f32 %v2427_v36, %v1357_v58  ;;  %v3273_v60 = vpop.f32.mrb[122].mxu1 }
 0x1e0   :  { %v2587_v61 = vadd.f32 %v4471_v28, %v2436_v57  ;;  %v2439_v62 = vadd.f32 %v3405_v38, %v3273_v60  ;;  %v1360_v63 = vpop.f32.mrb[123].mxu1 }
 0x1e1   :  { %v2585_v0 = vadd.f32 %v4471_v28, %v2428_v59  ;;  %v2431_v1 = vadd.f32 %v2430_v39, %v1360_v63 }
 0x1e2   :  { %2715 = vst.msk [vmem:[#allocation2 + $0x3d0] sm:$0xff] %vm1720_vm0, %v2587_v61  ;;  %v2588_v2 = vadd.f32 %v4471_v28, %v2439_v62 }
 0x1e3   :  { %2713 = vst.msk [vmem:[#allocation2 + $0x3c0] sm:$0xff] %vm1720_vm0, %v2585_v0  ;;  %v2586_v4 = vadd.f32 %v4471_v28, %v2431_v1 }
 0x1e4   :  { %2716 = vst.msk [vmem:[#allocation2 + $0x3d8] sm:$0xff] %vm1720_vm0, %v2588_v2 }
 0x1e5   :  { %2714 = vst.msk [vmem:[#allocation2 + $0x3c8] sm:$0xff] %vm1720_vm0, %v2586_v4  ;;  %v3276_v5 = vpop.f32.mrb[124].mxu1 }
 0x1e6   :  { %v2452_v6 = vadd.f32 %v3408_v50, %v3276_v5  ;;  %v1373_v7 = vpop.f32.mrb[125].mxu1 }
 0x1e7   :  { %v2444_v8 = vadd.f32 %v2443_v52, %v1373_v7  ;;  %v3277_v9 = vpop.f32.mrb[126].mxu1 }
 0x1e8   :  { %v2591_v10 = vadd.f32 %v4471_v28, %v2452_v6  ;;  %v2455_v11 = vadd.f32 %v3409_v54, %v3277_v9  ;;  %v1376_v12 = vpop.f32.mrb[127].mxu1 }
 0x1e9   :  { %v2589_v13 = vadd.f32 %v4471_v28, %v2444_v8  ;;  %v2447_v14 = vadd.f32 %v2446_v55, %v1376_v12 }
 0x1ea   :  { %2719 = vst.msk [vmem:[#allocation2 + $0x3f0] sm:$0xff] %vm1720_vm0, %v2591_v10  ;;  %v2592_v15 = vadd.f32 %v4471_v28, %v2455_v11 }
 0x1eb   :  { %2717 = vst.msk [vmem:[#allocation2 + $0x3e0] sm:$0xff] %vm1720_vm0, %v2589_v13  ;;  %v2590_v16 = vadd.f32 %v4471_v28, %v2447_v14 }
 0x1ec   :  { %2720 = vst.msk [vmem:[#allocation2 + $0x3f8] sm:$0xff] %vm1720_vm0, %v2592_v15 }
 0x1ed   :  { %2718 = vst.msk [vmem:[#allocation2 + $0x3e8] sm:$0xff] %vm1720_vm0, %v2590_v16 }
 0x1ee   :  { %3689 = shalt.err (!%p3686_p4)
}
 0x1ef   :  { %s3690_s26 = scalar_lea.hbm %s4554_s5, 16384 }
 0x1f0   :  { %p3691_p5 = scmp.ne.s32.totalorder %s4554_s5, %s3690_s26  ;;  %p3694_p6 = scmp.lt.u32.totalorder %s3690_s26, %s4554_s5 }
 0x1f2   :  { %p3696_p7 = pnand %p3694_p6, %p3691_p5 }
 0x1f4   :  { %3699 = shalt.err (!%p3696_p7)
}
 0x1f5   :  { %s3703_s6 = smov 128   ;;  %s3704_s7 = smov 8  }
 0x1f6   :  { %2732 = dma.vmem_to_hbm [thread:$0]  %s2727_s23, 16384, %s4554_s5, [#allocation3], %s3703_s6, %s3703_s6, %s3704_s7  }
 0x1f7   :  { %3700 = dma.done.wait [#allocation3], 16384  }
 0x1f8   :  { %3701 = vsyncadd [#allocation3], 4294950912 }
 0x1f9   :  { %2736 = vsyncpa [#allocation3], 1 }

</bundles_post_ra>
